<compile_context>
chip_gen: v7x
topology: tpu7x:2x2x1
jax: 0.10.0
libtpu: 0.0.40
codegen_flags: <defaults>
</compile_context>

<pallas_src>
import functools

import jax
import jax.numpy as jnp
from jax.experimental import pallas as pl
from jax.experimental.pallas import tpu as pltpu


# --------------------------------------------------------------------------
# Packed-weight layout helpers (shared by the packer and the kernel factory).
# --------------------------------------------------------------------------
def _round_up(n, m=8):
    return ((n + m - 1) // m) * m


def _weight_layout(bow_dim, hidden_size, num_layers):
    """Row offsets (8-aligned) of each gate-fused weight inside the packed slab."""
    offs = {}
    r = 0
    for l in range(num_layers):
        d_in = bow_dim if l == 0 else hidden_size
        offs[("w_ih", l)] = (r, d_in); r += _round_up(d_in)
        offs[("w_hh", l)] = (r, hidden_size); r += _round_up(hidden_size)
        offs[("b", l)] = (r, 1); r += 8
    offs["w_ih_c"] = (r, hidden_size); r += _round_up(hidden_size)
    offs["w_hh_c"] = (r, hidden_size); r += _round_up(hidden_size)
    offs["b_c"] = (r, 1); r += 8
    return offs, r


def _pack_weights(summ_weights, ctrl_weights, bow_dim, hidden_size, num_layers):
    """Pack every weight/bias into one lane-dense [R, 4H] f32 buffer (1 DMA)."""
    four_h = 4 * hidden_size
    pieces = []

    def pad_rows(a, rows):
        a = a.astype(jnp.float32)
        pad = _round_up(rows) - rows
        if pad:
            a = jnp.concatenate([a, jnp.zeros((pad, four_h), jnp.float32)], axis=0)
        return a

    for l, (w_ih, w_hh, b) in enumerate(summ_weights):
        d_in = bow_dim if l == 0 else hidden_size
        pieces += [pad_rows(w_ih, d_in), pad_rows(w_hh, hidden_size), pad_rows(b, 1)]
    w_ih_c, w_hh_c, b_c = ctrl_weights
    pieces += [pad_rows(w_ih_c, hidden_size), pad_rows(w_hh_c, hidden_size),
               pad_rows(b_c, 1)]
    return jnp.concatenate(pieces, axis=0)


# --------------------------------------------------------------------------
# Fused kernel: stacked masked LSTM over time + control LSTM, all in VMEM.
# --------------------------------------------------------------------------
def _make_fused_kernel(num_layers, T, K, H, max_word_length, bow_dim):
    offs, _ = _weight_layout(bow_dim, H, num_layers)
    LK = num_layers * K

    def kernel(x_ref, len_ref, w_ref, st_ref,      # inputs
               hij_ref, hs_ref, st_out_ref,        # outputs
               act_ref):                           # VMEM scratch [T*K, H]
        lengths = len_ref[...]                     # [K, 1] int32
        state0 = st_ref[...]                       # [2*L*K + 2, H]

        # Zero the hij pad rows once (rows t in [T, maxW)).
        if max_word_length > T:
            hij_ref[T:max_word_length] = jnp.zeros(
                (max_word_length - T, K, H), jnp.float32)

        # Validity masks computed ONCE, reused by every layer.
        masks = [jnp.broadcast_to(lengths > t, (K, H)) for t in range(T)]

        def wslice(key):
            r, rows = offs[key]
            return w_ref[r:r + rows, :]            # static, 8-aligned slice

        def cell(pre, h, c):
            """pre: [rows, 4H] gate pre-activations (i,f,g,o)."""
            sig = jax.nn.sigmoid(pre)              # one full-width sigmoid
            tnh = jnp.tanh(pre)                    # one full-width tanh
            i_g = sig[:, 0:H]
            f_g = sig[:, H:2 * H]
            g_g = tnh[:, 2 * H:3 * H]
            o_g = sig[:, 3 * H:4 * H]
            c_new = f_g * c + i_g * g_g
            h_new = o_g * jnp.tanh(c_new)
            return h_new, c_new

        # ---- stacked (multi-layer) masked LSTM over the word sequence ------
        h_last = None
        for l in range(num_layers):
            w_ih = wslice(("w_ih", l))             # [D_in, 4H]
            w_hh = wslice(("w_hh", l))             # [H, 4H]
            b = wslice(("b", l))                   # [1, 4H]

            cur_in = x_ref[...] if l == 0 else act_ref[...]   # [T*K, D_in]
            # Hoisted non-recurrent input projection: ONE matmul for all T steps.
            xproj = jnp.dot(cur_in, w_ih,
                            preferred_element_type=jnp.float32) + b   # [T*K, 4H]

            h = state0[l * K:(l + 1) * K, :]       # [K, H]
            c = state0[LK + l * K:LK + (l + 1) * K, :]
            last_layer = (l == num_layers - 1)
            for t in range(T):
                pre = xproj[t * K:(t + 1) * K, :] + jnp.dot(
                    h, w_hh, preferred_element_type=jnp.float32)      # [K, 4H]
                h_new, c_new = cell(pre, h, c)
                m = masks[t]
                h = jnp.where(m, h_new, h)         # freeze past length
                c = jnp.where(m, c_new, c)
                h_out = jnp.where(m, h_new, 0.0)   # zero padded outputs
                if last_layer:
                    hij_ref[t] = h_out             # contiguous [K,H] block store
                else:
                    act_ref[t * K:(t + 1) * K, :] = h_out
            st_out_ref[l * K:(l + 1) * K, :] = h
            st_out_ref[LK + l * K:LK + (l + 1) * K, :] = c
            if last_layer:
                h_last = h

        # ---- control LSTM over the K final hiddens (seq=K, batch=1) --------
        w_ih_c = wslice("w_ih_c")                  # [H, 4H]
        w_hh_c = wslice("w_hh_c")                  # [H, 4H]
        b_c = wslice("b_c")                        # [1, 4H]
        # Hoisted input projection for all K control steps.
        xproj_c = jnp.dot(h_last, w_ih_c,
                          preferred_element_type=jnp.float32) + b_c   # [K, 4H]
        hc = state0[2 * LK:2 * LK + 1, :]          # [1, H]
        cc = state0[2 * LK + 1:2 * LK + 2, :]
        for k in range(K):
            pre = xproj_c[k:k + 1, :] + jnp.dot(
                hc, w_hh_c, preferred_element_type=jnp.float32)       # [1, 4H]
            hc, cc = cell(pre, hc, cc)
            hs_ref[k:k + 1, :] = hc                # per-row store, no concat
        st_out_ref[2 * LK:2 * LK + 1, :] = hc
        st_out_ref[2 * LK + 1:2 * LK + 2, :] = cc

    return kernel


def _full_spec(shape):
    zeros = (0,) * len(shape)
    return pl.BlockSpec(shape, lambda i, _z=zeros: _z)


def hier_attn_fused(x_flat, lengths_2d, w_packed, state_in, *,
                    num_layers, T, K, H, max_word_length, bow_dim):
    """Single fused pallas_call for the whole HierAttnEncoder forward."""
    assert max_word_length >= T
    kernel = _make_fused_kernel(num_layers, T, K, H, max_word_length, bow_dim)

    inputs = (x_flat, lengths_2d, w_packed, state_in)
    out_shape = (
        jax.ShapeDtypeStruct((max_word_length, K, H), jnp.float32),  # hij (time-major)
        jax.ShapeDtypeStruct((K, H), jnp.float32),                   # hidden_summaries
        jax.ShapeDtypeStruct(state_in.shape, jnp.float32),           # packed new state
    )
    return pl.pallas_call(
        kernel,
        out_shape=out_shape,
        grid=(1,),
        in_specs=[_full_spec(a.shape) for a in inputs],
        out_specs=tuple(_full_spec(s.shape) for s in out_shape),
        scratch_shapes=[pltpu.VMEM((T * K, H), jnp.float32)],
        input_output_aliases={3: 2},               # state_in -> packed new state
        compiler_params=pltpu.CompilerParams(
            dimension_semantics=("arbitrary",)),
    )(*inputs)


# --------------------------------------------------------------------------
# Parameter construction (gate-FUSED layout [D_in, 4H]; bias = b_ih + b_hh).
# --------------------------------------------------------------------------
def init_params(key, vocab_size, bow_dim, hidden_size, num_layers):
    params = {}
    bound = 1.0 / (hidden_size ** 0.5)
    keys = jax.random.split(key, 1 + 4 * num_layers + 4)
    four_h = 4 * hidden_size

    def uni(k, shape):
        return jax.random.uniform(k, shape, jnp.float32, -bound, bound)

    params["embedding"] = jax.random.normal(
        keys[0], (vocab_size, bow_dim), jnp.float32)

    summ = []
    ki = 1
    for layer in range(num_layers):
        d_in = bow_dim if layer == 0 else hidden_size
        w_ih = uni(keys[ki + 0], (d_in, four_h))          # gates i,f,g,o on lanes
        w_hh = uni(keys[ki + 1], (hidden_size, four_h))
        b_ih = uni(keys[ki + 2], (1, four_h))
        b_hh = uni(keys[ki + 3], (1, four_h))
        summ.append((w_ih, w_hh, b_ih + b_hh))
        ki += 4
    params["summ_lstm"] = summ

    w_ih_c = uni(keys[ki + 0], (hidden_size, four_h))
    w_hh_c = uni(keys[ki + 1], (hidden_size, four_h))
    b_ih_c = uni(keys[ki + 2], (1, four_h))
    b_hh_c = uni(keys[ki + 3], (1, four_h))
    params["control_lstm"] = (w_ih_c, w_hh_c, b_ih_c + b_hh_c)
    return params


# --------------------------------------------------------------------------
# Forward pass (mirrors HierAttnEncoder.forward)
# --------------------------------------------------------------------------
@functools.partial(jax.jit, static_argnames=("num_layers", "max_word_length"))
def hier_attn_encoder_forward(params, token_ids, lengths, hidden_state,
                              summ_hidden_state, *, num_layers, max_word_length):
    K, T = token_ids.shape
    bow_dim = params["embedding"].shape[1]
    H = params["control_lstm"][0].shape[0]

    # Embedding lookup, time-major then flattened to [T*K, bow] (XLA glue).
    x = jnp.take(params["embedding"], token_ids.T, axis=0)        # [T, K, bow]
    x_flat = x.reshape(T * K, bow_dim).astype(jnp.float32)

    # pack_padded_sequence mask source: step t valid for seq k iff t < lengths[k].
    lengths_2d = lengths.reshape(K, 1).astype(jnp.int32)

    # One weight slab and one state slab -> 4 input DMAs total.
    w_packed = _pack_weights(params["summ_lstm"], params["control_lstm"],
                             bow_dim, H, num_layers)
    h0s, c0s = summ_hidden_state                                  # each [L, K, H]
    state_in = jnp.concatenate([
        h0s.reshape(num_layers * K, H).astype(jnp.float32),
        c0s.reshape(num_layers * K, H).astype(jnp.float32),
        hidden_state[0].reshape(1, H).astype(jnp.float32),
        hidden_state[1].reshape(1, H).astype(jnp.float32)], axis=0)

    hij_tm, hidden_summaries, state_out = hier_attn_fused(
        x_flat, lengths_2d, w_packed, state_in,
        num_layers=num_layers, T=T, K=K, H=H,
        max_word_length=max_word_length, bow_dim=bow_dim)

    # Layout plumbing only: time-major -> batch-first, unpack the state slab.
    hij = jnp.transpose(hij_tm, (1, 0, 2))                        # [K, maxW, H]
    LK = num_layers * K
    hT = state_out[0:LK].reshape(num_layers, K, H)
    cT = state_out[LK:2 * LK].reshape(num_layers, K, H)
    hT_c = state_out[2 * LK:2 * LK + 1].reshape(1, 1, H)
    cT_c = state_out[2 * LK + 1:2 * LK + 2].reshape(1, 1, H)

    new_summ_hidden_state = (hT, cT)
    new_hidden_state = (hT_c, cT_c)
    return (hij, hidden_summaries), new_hidden_state, new_summ_hidden_state


# --------------------------------------------------------------------------
if __name__ == "__main__":
    vocab_size = 50
    bow_dim = 16
    hidden_size = 32
    num_layers = 2          # opt.summLstmLayers
    K = 4                   # opt.K (number of summaries / batch)
    T = 8                   # current padded word length
    max_word_length = 10    # opt.maxWordLength

    key = jax.random.PRNGKey(0)
    k_par, k_tok = jax.random.split(key)
    params = init_params(k_par, vocab_size, bow_dim, hidden_size, num_layers)

    token_ids = jax.random.randint(k_tok, (K, T), 0, vocab_size, jnp.int32)
    # pack_padded_sequence expects lengths sorted descending; max == T, all >= 1.
    lengths = jnp.array([8, 7, 5, 3], jnp.int32)

    # init_hidden(n=1, K=1) for the control LSTM state.
    hidden_state = (jnp.zeros((1, 1, hidden_size), jnp.float32),
                    jnp.zeros((1, 1, hidden_size), jnp.float32))
    # init_hidden(n=num_layers, K=K) for the summaries LSTM state.
    summ_hidden_state = (jnp.zeros((num_layers, K, hidden_size), jnp.float32),
                         jnp.zeros((num_layers, K, hidden_size), jnp.float32))

    (hij, hidden_summaries), new_hidden_state, new_summ_hidden_state = \
        hier_attn_encoder_forward(params, token_ids, lengths, hidden_state,
                                  summ_hidden_state, num_layers=num_layers,
                                  max_word_length=max_word_length)

    jax.block_until_ready((hij, hidden_summaries, new_hidden_state,
                           new_summ_hidden_state))

    assert hij.shape == (K, max_word_length, hidden_size)
    assert hidden_summaries.shape == (K, hidden_size)
    assert new_hidden_state[0].shape == (1, 1, hidden_size)
    assert new_summ_hidden_state[0].shape == (num_layers, K, hidden_size)
    print("KERNEL_OK")
</pallas_src>

<mosaic_0001>
module attributes {stable_mosaic.version = 11 : i64} {
  func.func @kernel(%arg0: i32, %arg1: memref<32x16xf32, #tpu.memory_space<vmem>>, %arg2: memref<4x1xi32, #tpu.memory_space<vmem>>, %arg3: memref<200x128xf32, #tpu.memory_space<vmem>>, %arg4: memref<18x32xf32, #tpu.memory_space<vmem>>, %arg5: memref<10x4x32xf32, #tpu.memory_space<vmem>>, %arg6: memref<4x32xf32, #tpu.memory_space<vmem>>, %arg7: memref<18x32xf32, #tpu.memory_space<vmem>>, %arg8: memref<32x32xf32, #tpu.memory_space<vmem>>) attributes {dimension_semantics = [#tpu.dimension_semantics<arbitrary>], iteration_bounds = array<i64: 1>, scalar_prefetch = 0 : i64, scratch_operands = 1 : i64, tpu.core_type = #tpu.core_type<tc>, window_params = [{pipeline_mode = #tpu.pipeline_mode<synchronous>, transform_indices = @transform_0, window_bounds = array<i64: 32, 16>}, {pipeline_mode = #tpu.pipeline_mode<synchronous>, transform_indices = @transform_1, window_bounds = array<i64: 4, 1>}, {pipeline_mode = #tpu.pipeline_mode<synchronous>, transform_indices = @transform_2, window_bounds = array<i64: 200, 128>}, {pipeline_mode = #tpu.pipeline_mode<synchronous>, transform_indices = @transform_3, window_bounds = array<i64: 18, 32>}, {pipeline_mode = #tpu.pipeline_mode<synchronous>, transform_indices = @transform_4, window_bounds = array<i64: 10, 4, 32>}, {pipeline_mode = #tpu.pipeline_mode<synchronous>, transform_indices = @transform_5, window_bounds = array<i64: 4, 32>}, {pipeline_mode = #tpu.pipeline_mode<synchronous>, transform_indices = @transform_6, window_bounds = array<i64: 18, 32>}]} {
    %c0 = arith.constant 0 : index
    %c0_0 = arith.constant 0 : index
    %0 = vector.load %arg2[%c0, %c0_0] : memref<4x1xi32, #tpu.memory_space<vmem>>, vector<4x1xi32>
    %c0_1 = arith.constant 0 : index
    %c0_2 = arith.constant 0 : index
    %1 = vector.load %arg4[%c0_1, %c0_2] : memref<18x32xf32, #tpu.memory_space<vmem>>, vector<18x32xf32>
    %cst = arith.constant 0.000000e+00 : f32
    %2 = vector.broadcast %cst : f32 to vector<2x4x32xf32>
    %c8 = arith.constant 8 : index
    %c0_3 = arith.constant 0 : index
    %c0_4 = arith.constant 0 : index
    %3 = vector.load %arg5[%c8, %c0_3, %c0_4] : memref<10x4x32xf32, #tpu.memory_space<vmem>>, vector<2x4x32xf32>
    tpu.vector_store %arg5[%c8, %c0_3, %c0_4], %2 {strides = array<i32>} : memref<10x4x32xf32, #tpu.memory_space<vmem>>, vector<2x4x32xf32>,
    %c0_i32 = arith.constant 0 : i32
    %4 = vector.broadcast %c0_i32 : i32 to vector<4x1xi32>
    %5 = arith.cmpi sgt, %0, %4 : vector<4x1xi32>
    %6 = vector.shape_cast %5 : vector<4x1xi1> to vector<4x1xi1>
    %7 = vector.broadcast %6 : vector<4x1xi1> to vector<4x32xi1>
    %c1_i32 = arith.constant 1 : i32
    %8 = vector.broadcast %c1_i32 : i32 to vector<4x1xi32>
    %9 = arith.cmpi sgt, %0, %8 : vector<4x1xi32>
    %10 = vector.shape_cast %9 : vector<4x1xi1> to vector<4x1xi1>
    %11 = vector.broadcast %10 : vector<4x1xi1> to vector<4x32xi1>
    %c2_i32 = arith.constant 2 : i32
    %12 = vector.broadcast %c2_i32 : i32 to vector<4x1xi32>
    %13 = arith.cmpi sgt, %0, %12 : vector<4x1xi32>
    %14 = vector.shape_cast %13 : vector<4x1xi1> to vector<4x1xi1>
    %15 = vector.broadcast %14 : vector<4x1xi1> to vector<4x32xi1>
    %c3_i32 = arith.constant 3 : i32
    %16 = vector.broadcast %c3_i32 : i32 to vector<4x1xi32>
    %17 = arith.cmpi sgt, %0, %16 : vector<4x1xi32>
    %18 = vector.shape_cast %17 : vector<4x1xi1> to vector<4x1xi1>
    %19 = vector.broadcast %18 : vector<4x1xi1> to vector<4x32xi1>
    %c4_i32 = arith.constant 4 : i32
    %20 = vector.broadcast %c4_i32 : i32 to vector<4x1xi32>
    %21 = arith.cmpi sgt, %0, %20 : vector<4x1xi32>
    %22 = vector.shape_cast %21 : vector<4x1xi1> to vector<4x1xi1>
    %23 = vector.broadcast %22 : vector<4x1xi1> to vector<4x32xi1>
    %c5_i32 = arith.constant 5 : i32
    %24 = vector.broadcast %c5_i32 : i32 to vector<4x1xi32>
    %25 = arith.cmpi sgt, %0, %24 : vector<4x1xi32>
    %26 = vector.shape_cast %25 : vector<4x1xi1> to vector<4x1xi1>
    %27 = vector.broadcast %26 : vector<4x1xi1> to vector<4x32xi1>
    %c6_i32 = arith.constant 6 : i32
    %28 = vector.broadcast %c6_i32 : i32 to vector<4x1xi32>
    %29 = arith.cmpi sgt, %0, %28 : vector<4x1xi32>
    %30 = vector.shape_cast %29 : vector<4x1xi1> to vector<4x1xi1>
    %31 = vector.broadcast %30 : vector<4x1xi1> to vector<4x32xi1>
    %c7_i32 = arith.constant 7 : i32
    %32 = vector.broadcast %c7_i32 : i32 to vector<4x1xi32>
    %33 = arith.cmpi sgt, %0, %32 : vector<4x1xi32>
    %34 = vector.shape_cast %33 : vector<4x1xi1> to vector<4x1xi1>
    %35 = vector.broadcast %34 : vector<4x1xi1> to vector<4x32xi1>
    %c0_5 = arith.constant 0 : index
    %c0_6 = arith.constant 0 : index
    %36 = vector.load %arg3[%c0_5, %c0_6] : memref<200x128xf32, #tpu.memory_space<vmem>>, vector<16x128xf32>
    %c16 = arith.constant 16 : index
    %c0_7 = arith.constant 0 : index
    %37 = vector.load %arg3[%c16, %c0_7] : memref<200x128xf32, #tpu.memory_space<vmem>>, vector<32x128xf32>
    %c48 = arith.constant 48 : index
    %c0_8 = arith.constant 0 : index
    %38 = vector.load %arg3[%c48, %c0_8] : memref<200x128xf32, #tpu.memory_space<vmem>>, vector<1x128xf32>
    %c0_9 = arith.constant 0 : index
    %c0_10 = arith.constant 0 : index
    %39 = vector.load %arg1[%c0_9, %c0_10] : memref<32x16xf32, #tpu.memory_space<vmem>>, vector<32x16xf32>
    %cst_11 = arith.constant dense<0.000000e+00> : vector<32x128xf32>
    %40 = tpu.matmul %39, %36, %cst_11 {dimension_numbers = #tpu.dot_dimension_numbers<[1], [0], [0], [1], [0, 0, 1, 1], [], []>} : vector<32x16xf32>, vector<16x128xf32>, vector<32x128xf32> -> vector<32x128xf32>
    %41 = vector.broadcast %38 : vector<1x128xf32> to vector<32x128xf32>
    %42 = arith.addf %40, %41 : vector<32x128xf32>
    %43 = vector.extract_strided_slice %1 {offsets = [0, 0], sizes = [4, 32], strides = [1, 1]} : vector<18x32xf32> to vector<4x32xf32>
    %44 = vector.extract_strided_slice %1 {offsets = [8, 0], sizes = [4, 32], strides = [1, 1]} : vector<18x32xf32> to vector<4x32xf32>
    %45 = vector.extract_strided_slice %42 {offsets = [0, 0], sizes = [4, 128], strides = [1, 1]} : vector<32x128xf32> to vector<4x128xf32>
    %cst_12 = arith.constant dense<0.000000e+00> : vector<4x128xf32>
    %46 = tpu.matmul %43, %37, %cst_12 {dimension_numbers = #tpu.dot_dimension_numbers<[1], [0], [0], [1], [0, 0, 1, 1], [], []>} : vector<4x32xf32>, vector<32x128xf32>, vector<4x128xf32> -> vector<4x128xf32>
    %47 = arith.addf %45, %46 : vector<4x128xf32>
    %48 = arith.negf %47 : vector<4x128xf32>
    %49 = math.exp %48 : vector<4x128xf32>
    %cst_13 = arith.constant 1.000000e+00 : f32
    %50 = vector.broadcast %cst_13 : f32 to vector<4x128xf32>
    %51 = arith.addf %50, %49 : vector<4x128xf32>
    %52 = arith.divf %50, %51 : vector<4x128xf32>
    %53 = math.tanh %47 : vector<4x128xf32>
    %54 = vector.extract_strided_slice %52 {offsets = [0, 0], sizes = [4, 32], strides = [1, 1]} : vector<4x128xf32> to vector<4x32xf32>
    %55 = vector.extract_strided_slice %52 {offsets = [0, 32], sizes = [4, 32], strides = [1, 1]} : vector<4x128xf32> to vector<4x32xf32>
    %56 = vector.extract_strided_slice %53 {offsets = [0, 64], sizes = [4, 32], strides = [1, 1]} : vector<4x128xf32> to vector<4x32xf32>
    %57 = vector.extract_strided_slice %52 {offsets = [0, 96], sizes = [4, 32], strides = [1, 1]} : vector<4x128xf32> to vector<4x32xf32>
    %58 = arith.mulf %55, %44 : vector<4x32xf32>
    %59 = arith.mulf %54, %56 : vector<4x32xf32>
    %60 = arith.addf %58, %59 : vector<4x32xf32>
    %61 = math.tanh %60 : vector<4x32xf32>
    %62 = arith.mulf %57, %61 : vector<4x32xf32>
    %63 = arith.select %7, %62, %43 : vector<4x32xi1>, vector<4x32xf32>
    %64 = arith.select %7, %60, %44 : vector<4x32xi1>, vector<4x32xf32>
    %cst_14 = arith.constant 0.000000e+00 : f32
    %65 = vector.broadcast %cst_14 : f32 to vector<4x32xf32>
    %66 = arith.select %7, %62, %65 : vector<4x32xi1>, vector<4x32xf32>
    %c0_15 = arith.constant 0 : index
    %c0_16 = arith.constant 0 : index
    %67 = vector.load %arg8[%c0_15, %c0_16] : memref<32x32xf32, #tpu.memory_space<vmem>>, vector<4x32xf32>
    tpu.vector_store %arg8[%c0_15, %c0_16], %66 {strides = array<i32>} : memref<32x32xf32, #tpu.memory_space<vmem>>, vector<4x32xf32>,
    %68 = vector.extract_strided_slice %42 {offsets = [4, 0], sizes = [4, 128], strides = [1, 1]} : vector<32x128xf32> to vector<4x128xf32>
    %cst_17 = arith.constant dense<0.000000e+00> : vector<4x128xf32>
    %69 = tpu.matmul %63, %37, %cst_17 {dimension_numbers = #tpu.dot_dimension_numbers<[1], [0], [0], [1], [0, 0, 1, 1], [], []>} : vector<4x32xf32>, vector<32x128xf32>, vector<4x128xf32> -> vector<4x128xf32>
    %70 = arith.addf %68, %69 : vector<4x128xf32>
    %71 = arith.negf %70 : vector<4x128xf32>
    %72 = math.exp %71 : vector<4x128xf32>
    %cst_18 = arith.constant 1.000000e+00 : f32
    %73 = vector.broadcast %cst_18 : f32 to vector<4x128xf32>
    %74 = arith.addf %73, %72 : vector<4x128xf32>
    %75 = arith.divf %73, %74 : vector<4x128xf32>
    %76 = math.tanh %70 : vector<4x128xf32>
    %77 = vector.extract_strided_slice %75 {offsets = [0, 0], sizes = [4, 32], strides = [1, 1]} : vector<4x128xf32> to vector<4x32xf32>
    %78 = vector.extract_strided_slice %75 {offsets = [0, 32], sizes = [4, 32], strides = [1, 1]} : vector<4x128xf32> to vector<4x32xf32>
    %79 = vector.extract_strided_slice %76 {offsets = [0, 64], sizes = [4, 32], strides = [1, 1]} : vector<4x128xf32> to vector<4x32xf32>
    %80 = vector.extract_strided_slice %75 {offsets = [0, 96], sizes = [4, 32], strides = [1, 1]} : vector<4x128xf32> to vector<4x32xf32>
    %81 = arith.mulf %78, %64 : vector<4x32xf32>
    %82 = arith.mulf %77, %79 : vector<4x32xf32>
    %83 = arith.addf %81, %82 : vector<4x32xf32>
    %84 = math.tanh %83 : vector<4x32xf32>
    %85 = arith.mulf %80, %84 : vector<4x32xf32>
    %86 = arith.select %11, %85, %63 : vector<4x32xi1>, vector<4x32xf32>
    %87 = arith.select %11, %83, %64 : vector<4x32xi1>, vector<4x32xf32>
    %cst_19 = arith.constant 0.000000e+00 : f32
    %88 = vector.broadcast %cst_19 : f32 to vector<4x32xf32>
    %89 = arith.select %11, %85, %88 : vector<4x32xi1>, vector<4x32xf32>
    %c4 = arith.constant 4 : index
    %c0_20 = arith.constant 0 : index
    %90 = vector.load %arg8[%c4, %c0_20] : memref<32x32xf32, #tpu.memory_space<vmem>>, vector<4x32xf32>
    tpu.vector_store %arg8[%c4, %c0_20], %89 {strides = array<i32>} : memref<32x32xf32, #tpu.memory_space<vmem>>, vector<4x32xf32>,
    %91 = vector.extract_strided_slice %42 {offsets = [8, 0], sizes = [4, 128], strides = [1, 1]} : vector<32x128xf32> to vector<4x128xf32>
    %cst_21 = arith.constant dense<0.000000e+00> : vector<4x128xf32>
    %92 = tpu.matmul %86, %37, %cst_21 {dimension_numbers = #tpu.dot_dimension_numbers<[1], [0], [0], [1], [0, 0, 1, 1], [], []>} : vector<4x32xf32>, vector<32x128xf32>, vector<4x128xf32> -> vector<4x128xf32>
    %93 = arith.addf %91, %92 : vector<4x128xf32>
    %94 = arith.negf %93 : vector<4x128xf32>
    %95 = math.exp %94 : vector<4x128xf32>
    %cst_22 = arith.constant 1.000000e+00 : f32
    %96 = vector.broadcast %cst_22 : f32 to vector<4x128xf32>
    %97 = arith.addf %96, %95 : vector<4x128xf32>
    %98 = arith.divf %96, %97 : vector<4x128xf32>
    %99 = math.tanh %93 : vector<4x128xf32>
    %100 = vector.extract_strided_slice %98 {offsets = [0, 0], sizes = [4, 32], strides = [1, 1]} : vector<4x128xf32> to vector<4x32xf32>
    %101 = vector.extract_strided_slice %98 {offsets = [0, 32], sizes = [4, 32], strides = [1, 1]} : vector<4x128xf32> to vector<4x32xf32>
    %102 = vector.extract_strided_slice %99 {offsets = [0, 64], sizes = [4, 32], strides = [1, 1]} : vector<4x128xf32> to vector<4x32xf32>
    %103 = vector.extract_strided_slice %98 {offsets = [0, 96], sizes = [4, 32], strides = [1, 1]} : vector<4x128xf32> to vector<4x32xf32>
    %104 = arith.mulf %101, %87 : vector<4x32xf32>
    %105 = arith.mulf %100, %102 : vector<4x32xf32>
    %106 = arith.addf %104, %105 : vector<4x32xf32>
    %107 = math.tanh %106 : vector<4x32xf32>
    %108 = arith.mulf %103, %107 : vector<4x32xf32>
    %109 = arith.select %15, %108, %86 : vector<4x32xi1>, vector<4x32xf32>
    %110 = arith.select %15, %106, %87 : vector<4x32xi1>, vector<4x32xf32>
    %cst_23 = arith.constant 0.000000e+00 : f32
    %111 = vector.broadcast %cst_23 : f32 to vector<4x32xf32>
    %112 = arith.select %15, %108, %111 : vector<4x32xi1>, vector<4x32xf32>
    %c8_24 = arith.constant 8 : index
    %c0_25 = arith.constant 0 : index
    %113 = vector.load %arg8[%c8_24, %c0_25] : memref<32x32xf32, #tpu.memory_space<vmem>>, vector<4x32xf32>
    tpu.vector_store %arg8[%c8_24, %c0_25], %112 {strides = array<i32>} : memref<32x32xf32, #tpu.memory_space<vmem>>, vector<4x32xf32>,
    %114 = vector.extract_strided_slice %42 {offsets = [12, 0], sizes = [4, 128], strides = [1, 1]} : vector<32x128xf32> to vector<4x128xf32>
    %cst_26 = arith.constant dense<0.000000e+00> : vector<4x128xf32>
    %115 = tpu.matmul %109, %37, %cst_26 {dimension_numbers = #tpu.dot_dimension_numbers<[1], [0], [0], [1], [0, 0, 1, 1], [], []>} : vector<4x32xf32>, vector<32x128xf32>, vector<4x128xf32> -> vector<4x128xf32>
    %116 = arith.addf %114, %115 : vector<4x128xf32>
    %117 = arith.negf %116 : vector<4x128xf32>
    %118 = math.exp %117 : vector<4x128xf32>
    %cst_27 = arith.constant 1.000000e+00 : f32
    %119 = vector.broadcast %cst_27 : f32 to vector<4x128xf32>
    %120 = arith.addf %119, %118 : vector<4x128xf32>
    %121 = arith.divf %119, %120 : vector<4x128xf32>
    %122 = math.tanh %116 : vector<4x128xf32>
    %123 = vector.extract_strided_slice %121 {offsets = [0, 0], sizes = [4, 32], strides = [1, 1]} : vector<4x128xf32> to vector<4x32xf32>
    %124 = vector.extract_strided_slice %121 {offsets = [0, 32], sizes = [4, 32], strides = [1, 1]} : vector<4x128xf32> to vector<4x32xf32>
    %125 = vector.extract_strided_slice %122 {offsets = [0, 64], sizes = [4, 32], strides = [1, 1]} : vector<4x128xf32> to vector<4x32xf32>
    %126 = vector.extract_strided_slice %121 {offsets = [0, 96], sizes = [4, 32], strides = [1, 1]} : vector<4x128xf32> to vector<4x32xf32>
    %127 = arith.mulf %124, %110 : vector<4x32xf32>
    %128 = arith.mulf %123, %125 : vector<4x32xf32>
    %129 = arith.addf %127, %128 : vector<4x32xf32>
    %130 = math.tanh %129 : vector<4x32xf32>
    %131 = arith.mulf %126, %130 : vector<4x32xf32>
    %132 = arith.select %19, %131, %109 : vector<4x32xi1>, vector<4x32xf32>
    %133 = arith.select %19, %129, %110 : vector<4x32xi1>, vector<4x32xf32>
    %cst_28 = arith.constant 0.000000e+00 : f32
    %134 = vector.broadcast %cst_28 : f32 to vector<4x32xf32>
    %135 = arith.select %19, %131, %134 : vector<4x32xi1>, vector<4x32xf32>
    %c12 = arith.constant 12 : index
    %c0_29 = arith.constant 0 : index
    %136 = vector.load %arg8[%c12, %c0_29] : memref<32x32xf32, #tpu.memory_space<vmem>>, vector<4x32xf32>
    tpu.vector_store %arg8[%c12, %c0_29], %135 {strides = array<i32>} : memref<32x32xf32, #tpu.memory_space<vmem>>, vector<4x32xf32>,
    %137 = vector.extract_strided_slice %42 {offsets = [16, 0], sizes = [4, 128], strides = [1, 1]} : vector<32x128xf32> to vector<4x128xf32>
    %cst_30 = arith.constant dense<0.000000e+00> : vector<4x128xf32>
    %138 = tpu.matmul %132, %37, %cst_30 {dimension_numbers = #tpu.dot_dimension_numbers<[1], [0], [0], [1], [0, 0, 1, 1], [], []>} : vector<4x32xf32>, vector<32x128xf32>, vector<4x128xf32> -> vector<4x128xf32>
    %139 = arith.addf %137, %138 : vector<4x128xf32>
    %140 = arith.negf %139 : vector<4x128xf32>
    %141 = math.exp %140 : vector<4x128xf32>
    %cst_31 = arith.constant 1.000000e+00 : f32
    %142 = vector.broadcast %cst_31 : f32 to vector<4x128xf32>
    %143 = arith.addf %142, %141 : vector<4x128xf32>
    %144 = arith.divf %142, %143 : vector<4x128xf32>
    %145 = math.tanh %139 : vector<4x128xf32>
    %146 = vector.extract_strided_slice %144 {offsets = [0, 0], sizes = [4, 32], strides = [1, 1]} : vector<4x128xf32> to vector<4x32xf32>
    %147 = vector.extract_strided_slice %144 {offsets = [0, 32], sizes = [4, 32], strides = [1, 1]} : vector<4x128xf32> to vector<4x32xf32>
    %148 = vector.extract_strided_slice %145 {offsets = [0, 64], sizes = [4, 32], strides = [1, 1]} : vector<4x128xf32> to vector<4x32xf32>
    %149 = vector.extract_strided_slice %144 {offsets = [0, 96], sizes = [4, 32], strides = [1, 1]} : vector<4x128xf32> to vector<4x32xf32>
    %150 = arith.mulf %147, %133 : vector<4x32xf32>
    %151 = arith.mulf %146, %148 : vector<4x32xf32>
    %152 = arith.addf %150, %151 : vector<4x32xf32>
    %153 = math.tanh %152 : vector<4x32xf32>
    %154 = arith.mulf %149, %153 : vector<4x32xf32>
    %155 = arith.select %23, %154, %132 : vector<4x32xi1>, vector<4x32xf32>
    %156 = arith.select %23, %152, %133 : vector<4x32xi1>, vector<4x32xf32>
    %cst_32 = arith.constant 0.000000e+00 : f32
    %157 = vector.broadcast %cst_32 : f32 to vector<4x32xf32>
    %158 = arith.select %23, %154, %157 : vector<4x32xi1>, vector<4x32xf32>
    %c16_33 = arith.constant 16 : index
    %c0_34 = arith.constant 0 : index
    %159 = vector.load %arg8[%c16_33, %c0_34] : memref<32x32xf32, #tpu.memory_space<vmem>>, vector<4x32xf32>
    tpu.vector_store %arg8[%c16_33, %c0_34], %158 {strides = array<i32>} : memref<32x32xf32, #tpu.memory_space<vmem>>, vector<4x32xf32>,
    %160 = vector.extract_strided_slice %42 {offsets = [20, 0], sizes = [4, 128], strides = [1, 1]} : vector<32x128xf32> to vector<4x128xf32>
    %cst_35 = arith.constant dense<0.000000e+00> : vector<4x128xf32>
    %161 = tpu.matmul %155, %37, %cst_35 {dimension_numbers = #tpu.dot_dimension_numbers<[1], [0], [0], [1], [0, 0, 1, 1], [], []>} : vector<4x32xf32>, vector<32x128xf32>, vector<4x128xf32> -> vector<4x128xf32>
    %162 = arith.addf %160, %161 : vector<4x128xf32>
    %163 = arith.negf %162 : vector<4x128xf32>
    %164 = math.exp %163 : vector<4x128xf32>
    %cst_36 = arith.constant 1.000000e+00 : f32
    %165 = vector.broadcast %cst_36 : f32 to vector<4x128xf32>
    %166 = arith.addf %165, %164 : vector<4x128xf32>
    %167 = arith.divf %165, %166 : vector<4x128xf32>
    %168 = math.tanh %162 : vector<4x128xf32>
    %169 = vector.extract_strided_slice %167 {offsets = [0, 0], sizes = [4, 32], strides = [1, 1]} : vector<4x128xf32> to vector<4x32xf32>
    %170 = vector.extract_strided_slice %167 {offsets = [0, 32], sizes = [4, 32], strides = [1, 1]} : vector<4x128xf32> to vector<4x32xf32>
    %171 = vector.extract_strided_slice %168 {offsets = [0, 64], sizes = [4, 32], strides = [1, 1]} : vector<4x128xf32> to vector<4x32xf32>
    %172 = vector.extract_strided_slice %167 {offsets = [0, 96], sizes = [4, 32], strides = [1, 1]} : vector<4x128xf32> to vector<4x32xf32>
    %173 = arith.mulf %170, %156 : vector<4x32xf32>
    %174 = arith.mulf %169, %171 : vector<4x32xf32>
    %175 = arith.addf %173, %174 : vector<4x32xf32>
    %176 = math.tanh %175 : vector<4x32xf32>
    %177 = arith.mulf %172, %176 : vector<4x32xf32>
    %178 = arith.select %27, %177, %155 : vector<4x32xi1>, vector<4x32xf32>
    %179 = arith.select %27, %175, %156 : vector<4x32xi1>, vector<4x32xf32>
    %cst_37 = arith.constant 0.000000e+00 : f32
    %180 = vector.broadcast %cst_37 : f32 to vector<4x32xf32>
    %181 = arith.select %27, %177, %180 : vector<4x32xi1>, vector<4x32xf32>
    %c20 = arith.constant 20 : index
    %c0_38 = arith.constant 0 : index
    %182 = vector.load %arg8[%c20, %c0_38] : memref<32x32xf32, #tpu.memory_space<vmem>>, vector<4x32xf32>
    tpu.vector_store %arg8[%c20, %c0_38], %181 {strides = array<i32>} : memref<32x32xf32, #tpu.memory_space<vmem>>, vector<4x32xf32>,
    %183 = vector.extract_strided_slice %42 {offsets = [24, 0], sizes = [4, 128], strides = [1, 1]} : vector<32x128xf32> to vector<4x128xf32>
    %cst_39 = arith.constant dense<0.000000e+00> : vector<4x128xf32>
    %184 = tpu.matmul %178, %37, %cst_39 {dimension_numbers = #tpu.dot_dimension_numbers<[1], [0], [0], [1], [0, 0, 1, 1], [], []>} : vector<4x32xf32>, vector<32x128xf32>, vector<4x128xf32> -> vector<4x128xf32>
    %185 = arith.addf %183, %184 : vector<4x128xf32>
    %186 = arith.negf %185 : vector<4x128xf32>
    %187 = math.exp %186 : vector<4x128xf32>
    %cst_40 = arith.constant 1.000000e+00 : f32
    %188 = vector.broadcast %cst_40 : f32 to vector<4x128xf32>
    %189 = arith.addf %188, %187 : vector<4x128xf32>
    %190 = arith.divf %188, %189 : vector<4x128xf32>
    %191 = math.tanh %185 : vector<4x128xf32>
    %192 = vector.extract_strided_slice %190 {offsets = [0, 0], sizes = [4, 32], strides = [1, 1]} : vector<4x128xf32> to vector<4x32xf32>
    %193 = vector.extract_strided_slice %190 {offsets = [0, 32], sizes = [4, 32], strides = [1, 1]} : vector<4x128xf32> to vector<4x32xf32>
    %194 = vector.extract_strided_slice %191 {offsets = [0, 64], sizes = [4, 32], strides = [1, 1]} : vector<4x128xf32> to vector<4x32xf32>
    %195 = vector.extract_strided_slice %190 {offsets = [0, 96], sizes = [4, 32], strides = [1, 1]} : vector<4x128xf32> to vector<4x32xf32>
    %196 = arith.mulf %193, %179 : vector<4x32xf32>
    %197 = arith.mulf %192, %194 : vector<4x32xf32>
    %198 = arith.addf %196, %197 : vector<4x32xf32>
    %199 = math.tanh %198 : vector<4x32xf32>
    %200 = arith.mulf %195, %199 : vector<4x32xf32>
    %201 = arith.select %31, %200, %178 : vector<4x32xi1>, vector<4x32xf32>
    %202 = arith.select %31, %198, %179 : vector<4x32xi1>, vector<4x32xf32>
    %cst_41 = arith.constant 0.000000e+00 : f32
    %203 = vector.broadcast %cst_41 : f32 to vector<4x32xf32>
    %204 = arith.select %31, %200, %203 : vector<4x32xi1>, vector<4x32xf32>
    %c24 = arith.constant 24 : index
    %c0_42 = arith.constant 0 : index
    %205 = vector.load %arg8[%c24, %c0_42] : memref<32x32xf32, #tpu.memory_space<vmem>>, vector<4x32xf32>
    tpu.vector_store %arg8[%c24, %c0_42], %204 {strides = array<i32>} : memref<32x32xf32, #tpu.memory_space<vmem>>, vector<4x32xf32>,
    %206 = vector.extract_strided_slice %42 {offsets = [28, 0], sizes = [4, 128], strides = [1, 1]} : vector<32x128xf32> to vector<4x128xf32>
    %cst_43 = arith.constant dense<0.000000e+00> : vector<4x128xf32>
    %207 = tpu.matmul %201, %37, %cst_43 {dimension_numbers = #tpu.dot_dimension_numbers<[1], [0], [0], [1], [0, 0, 1, 1], [], []>} : vector<4x32xf32>, vector<32x128xf32>, vector<4x128xf32> -> vector<4x128xf32>
    %208 = arith.addf %206, %207 : vector<4x128xf32>
    %209 = arith.negf %208 : vector<4x128xf32>
    %210 = math.exp %209 : vector<4x128xf32>
    %cst_44 = arith.constant 1.000000e+00 : f32
    %211 = vector.broadcast %cst_44 : f32 to vector<4x128xf32>
    %212 = arith.addf %211, %210 : vector<4x128xf32>
    %213 = arith.divf %211, %212 : vector<4x128xf32>
    %214 = math.tanh %208 : vector<4x128xf32>
    %215 = vector.extract_strided_slice %213 {offsets = [0, 0], sizes = [4, 32], strides = [1, 1]} : vector<4x128xf32> to vector<4x32xf32>
    %216 = vector.extract_strided_slice %213 {offsets = [0, 32], sizes = [4, 32], strides = [1, 1]} : vector<4x128xf32> to vector<4x32xf32>
    %217 = vector.extract_strided_slice %214 {offsets = [0, 64], sizes = [4, 32], strides = [1, 1]} : vector<4x128xf32> to vector<4x32xf32>
    %218 = vector.extract_strided_slice %213 {offsets = [0, 96], sizes = [4, 32], strides = [1, 1]} : vector<4x128xf32> to vector<4x32xf32>
    %219 = arith.mulf %216, %202 : vector<4x32xf32>
    %220 = arith.mulf %215, %217 : vector<4x32xf32>
    %221 = arith.addf %219, %220 : vector<4x32xf32>
    %222 = math.tanh %221 : vector<4x32xf32>
    %223 = arith.mulf %218, %222 : vector<4x32xf32>
    %224 = arith.select %35, %223, %201 : vector<4x32xi1>, vector<4x32xf32>
    %225 = arith.select %35, %221, %202 : vector<4x32xi1>, vector<4x32xf32>
    %cst_45 = arith.constant 0.000000e+00 : f32
    %226 = vector.broadcast %cst_45 : f32 to vector<4x32xf32>
    %227 = arith.select %35, %223, %226 : vector<4x32xi1>, vector<4x32xf32>
    %c28 = arith.constant 28 : index
    %c0_46 = arith.constant 0 : index
    %228 = vector.load %arg8[%c28, %c0_46] : memref<32x32xf32, #tpu.memory_space<vmem>>, vector<4x32xf32>
    tpu.vector_store %arg8[%c28, %c0_46], %227 {strides = array<i32>} : memref<32x32xf32, #tpu.memory_space<vmem>>, vector<4x32xf32>,
    %c0_47 = arith.constant 0 : index
    %c0_48 = arith.constant 0 : index
    %229 = vector.load %arg7[%c0_47, %c0_48] : memref<18x32xf32, #tpu.memory_space<vmem>>, vector<4x32xf32>
    tpu.vector_store %arg7[%c0_47, %c0_48], %224 {strides = array<i32>} : memref<18x32xf32, #tpu.memory_space<vmem>>, vector<4x32xf32>,
    %c8_49 = arith.constant 8 : index
    %c0_50 = arith.constant 0 : index
    %230 = vector.load %arg7[%c8_49, %c0_50] : memref<18x32xf32, #tpu.memory_space<vmem>>, vector<4x32xf32>
    tpu.vector_store %arg7[%c8_49, %c0_50], %225 {strides = array<i32>} : memref<18x32xf32, #tpu.memory_space<vmem>>, vector<4x32xf32>,
    %c56 = arith.constant 56 : index
    %c0_51 = arith.constant 0 : index
    %231 = vector.load %arg3[%c56, %c0_51] : memref<200x128xf32, #tpu.memory_space<vmem>>, vector<32x128xf32>
    %c88 = arith.constant 88 : index
    %c0_52 = arith.constant 0 : index
    %232 = vector.load %arg3[%c88, %c0_52] : memref<200x128xf32, #tpu.memory_space<vmem>>, vector<32x128xf32>
    %c120 = arith.constant 120 : index
    %c0_53 = arith.constant 0 : index
    %233 = vector.load %arg3[%c120, %c0_53] : memref<200x128xf32, #tpu.memory_space<vmem>>, vector<1x128xf32>
    %c0_54 = arith.constant 0 : index
    %c0_55 = arith.constant 0 : index
    %234 = vector.load %arg8[%c0_54, %c0_55] : memref<32x32xf32, #tpu.memory_space<vmem>>, vector<32x32xf32>
    %cst_56 = arith.constant dense<0.000000e+00> : vector<32x128xf32>
    %235 = tpu.matmul %234, %231, %cst_56 {dimension_numbers = #tpu.dot_dimension_numbers<[1], [0], [0], [1], [0, 0, 1, 1], [], []>} : vector<32x32xf32>, vector<32x128xf32>, vector<32x128xf32> -> vector<32x128xf32>
    %236 = vector.broadcast %233 : vector<1x128xf32> to vector<32x128xf32>
    %237 = arith.addf %235, %236 : vector<32x128xf32>
    %238 = vector.extract_strided_slice %1 {offsets = [4, 0], sizes = [4, 32], strides = [1, 1]} : vector<18x32xf32> to vector<4x32xf32>
    %239 = vector.extract_strided_slice %1 {offsets = [12, 0], sizes = [4, 32], strides = [1, 1]} : vector<18x32xf32> to vector<4x32xf32>
    %240 = vector.extract_strided_slice %237 {offsets = [0, 0], sizes = [4, 128], strides = [1, 1]} : vector<32x128xf32> to vector<4x128xf32>
    %cst_57 = arith.constant dense<0.000000e+00> : vector<4x128xf32>
    %241 = tpu.matmul %238, %232, %cst_57 {dimension_numbers = #tpu.dot_dimension_numbers<[1], [0], [0], [1], [0, 0, 1, 1], [], []>} : vector<4x32xf32>, vector<32x128xf32>, vector<4x128xf32> -> vector<4x128xf32>
    %242 = arith.addf %240, %241 : vector<4x128xf32>
    %243 = arith.negf %242 : vector<4x128xf32>
    %244 = math.exp %243 : vector<4x128xf32>
    %cst_58 = arith.constant 1.000000e+00 : f32
    %245 = vector.broadcast %cst_58 : f32 to vector<4x128xf32>
    %246 = arith.addf %245, %244 : vector<4x128xf32>
    %247 = arith.divf %245, %246 : vector<4x128xf32>
    %248 = math.tanh %242 : vector<4x128xf32>
    %249 = vector.extract_strided_slice %247 {offsets = [0, 0], sizes = [4, 32], strides = [1, 1]} : vector<4x128xf32> to vector<4x32xf32>
    %250 = vector.extract_strided_slice %247 {offsets = [0, 32], sizes = [4, 32], strides = [1, 1]} : vector<4x128xf32> to vector<4x32xf32>
    %251 = vector.extract_strided_slice %248 {offsets = [0, 64], sizes = [4, 32], strides = [1, 1]} : vector<4x128xf32> to vector<4x32xf32>
    %252 = vector.extract_strided_slice %247 {offsets = [0, 96], sizes = [4, 32], strides = [1, 1]} : vector<4x128xf32> to vector<4x32xf32>
    %253 = arith.mulf %250, %239 : vector<4x32xf32>
    %254 = arith.mulf %249, %251 : vector<4x32xf32>
    %255 = arith.addf %253, %254 : vector<4x32xf32>
    %256 = math.tanh %255 : vector<4x32xf32>
    %257 = arith.mulf %252, %256 : vector<4x32xf32>
    %258 = arith.select %7, %257, %238 : vector<4x32xi1>, vector<4x32xf32>
    %259 = arith.select %7, %255, %239 : vector<4x32xi1>, vector<4x32xf32>
    %cst_59 = arith.constant 0.000000e+00 : f32
    %260 = vector.broadcast %cst_59 : f32 to vector<4x32xf32>
    %261 = arith.select %7, %257, %260 : vector<4x32xi1>, vector<4x32xf32>
    %c0_60 = arith.constant 0 : index
    %c0_61 = arith.constant 0 : index
    %c0_62 = arith.constant 0 : index
    %262 = vector.load %arg5[%c0_60, %c0_61, %c0_62] : memref<10x4x32xf32, #tpu.memory_space<vmem>>, vector<1x4x32xf32>
    %263 = vector.shape_cast %262 : vector<1x4x32xf32> to vector<4x32xf32>
    %264 = vector.shape_cast %261 : vector<4x32xf32> to vector<1x4x32xf32>
    tpu.vector_store %arg5[%c0_60, %c0_61, %c0_62], %264 {strides = array<i32>} : memref<10x4x32xf32, #tpu.memory_space<vmem>>, vector<1x4x32xf32>,
    %265 = vector.extract_strided_slice %237 {offsets = [4, 0], sizes = [4, 128], strides = [1, 1]} : vector<32x128xf32> to vector<4x128xf32>
    %cst_63 = arith.constant dense<0.000000e+00> : vector<4x128xf32>
    %266 = tpu.matmul %258, %232, %cst_63 {dimension_numbers = #tpu.dot_dimension_numbers<[1], [0], [0], [1], [0, 0, 1, 1], [], []>} : vector<4x32xf32>, vector<32x128xf32>, vector<4x128xf32> -> vector<4x128xf32>
    %267 = arith.addf %265, %266 : vector<4x128xf32>
    %268 = arith.negf %267 : vector<4x128xf32>
    %269 = math.exp %268 : vector<4x128xf32>
    %cst_64 = arith.constant 1.000000e+00 : f32
    %270 = vector.broadcast %cst_64 : f32 to vector<4x128xf32>
    %271 = arith.addf %270, %269 : vector<4x128xf32>
    %272 = arith.divf %270, %271 : vector<4x128xf32>
    %273 = math.tanh %267 : vector<4x128xf32>
    %274 = vector.extract_strided_slice %272 {offsets = [0, 0], sizes = [4, 32], strides = [1, 1]} : vector<4x128xf32> to vector<4x32xf32>
    %275 = vector.extract_strided_slice %272 {offsets = [0, 32], sizes = [4, 32], strides = [1, 1]} : vector<4x128xf32> to vector<4x32xf32>
    %276 = vector.extract_strided_slice %273 {offsets = [0, 64], sizes = [4, 32], strides = [1, 1]} : vector<4x128xf32> to vector<4x32xf32>
    %277 = vector.extract_strided_slice %272 {offsets = [0, 96], sizes = [4, 32], strides = [1, 1]} : vector<4x128xf32> to vector<4x32xf32>
    %278 = arith.mulf %275, %259 : vector<4x32xf32>
    %279 = arith.mulf %274, %276 : vector<4x32xf32>
    %280 = arith.addf %278, %279 : vector<4x32xf32>
    %281 = math.tanh %280 : vector<4x32xf32>
    %282 = arith.mulf %277, %281 : vector<4x32xf32>
    %283 = arith.select %11, %282, %258 : vector<4x32xi1>, vector<4x32xf32>
    %284 = arith.select %11, %280, %259 : vector<4x32xi1>, vector<4x32xf32>
    %cst_65 = arith.constant 0.000000e+00 : f32
    %285 = vector.broadcast %cst_65 : f32 to vector<4x32xf32>
    %286 = arith.select %11, %282, %285 : vector<4x32xi1>, vector<4x32xf32>
    %c1 = arith.constant 1 : index
    %c0_66 = arith.constant 0 : index
    %c0_67 = arith.constant 0 : index
    %287 = vector.load %arg5[%c1, %c0_66, %c0_67] : memref<10x4x32xf32, #tpu.memory_space<vmem>>, vector<1x4x32xf32>
    %288 = vector.shape_cast %287 : vector<1x4x32xf32> to vector<4x32xf32>
    %289 = vector.shape_cast %286 : vector<4x32xf32> to vector<1x4x32xf32>
    tpu.vector_store %arg5[%c1, %c0_66, %c0_67], %289 {strides = array<i32>} : memref<10x4x32xf32, #tpu.memory_space<vmem>>, vector<1x4x32xf32>,
    %290 = vector.extract_strided_slice %237 {offsets = [8, 0], sizes = [4, 128], strides = [1, 1]} : vector<32x128xf32> to vector<4x128xf32>
    %cst_68 = arith.constant dense<0.000000e+00> : vector<4x128xf32>
    %291 = tpu.matmul %283, %232, %cst_68 {dimension_numbers = #tpu.dot_dimension_numbers<[1], [0], [0], [1], [0, 0, 1, 1], [], []>} : vector<4x32xf32>, vector<32x128xf32>, vector<4x128xf32> -> vector<4x128xf32>
    %292 = arith.addf %290, %291 : vector<4x128xf32>
    %293 = arith.negf %292 : vector<4x128xf32>
    %294 = math.exp %293 : vector<4x128xf32>
    %cst_69 = arith.constant 1.000000e+00 : f32
    %295 = vector.broadcast %cst_69 : f32 to vector<4x128xf32>
    %296 = arith.addf %295, %294 : vector<4x128xf32>
    %297 = arith.divf %295, %296 : vector<4x128xf32>
    %298 = math.tanh %292 : vector<4x128xf32>
    %299 = vector.extract_strided_slice %297 {offsets = [0, 0], sizes = [4, 32], strides = [1, 1]} : vector<4x128xf32> to vector<4x32xf32>
    %300 = vector.extract_strided_slice %297 {offsets = [0, 32], sizes = [4, 32], strides = [1, 1]} : vector<4x128xf32> to vector<4x32xf32>
    %301 = vector.extract_strided_slice %298 {offsets = [0, 64], sizes = [4, 32], strides = [1, 1]} : vector<4x128xf32> to vector<4x32xf32>
    %302 = vector.extract_strided_slice %297 {offsets = [0, 96], sizes = [4, 32], strides = [1, 1]} : vector<4x128xf32> to vector<4x32xf32>
    %303 = arith.mulf %300, %284 : vector<4x32xf32>
    %304 = arith.mulf %299, %301 : vector<4x32xf32>
    %305 = arith.addf %303, %304 : vector<4x32xf32>
    %306 = math.tanh %305 : vector<4x32xf32>
    %307 = arith.mulf %302, %306 : vector<4x32xf32>
    %308 = arith.select %15, %307, %283 : vector<4x32xi1>, vector<4x32xf32>
    %309 = arith.select %15, %305, %284 : vector<4x32xi1>, vector<4x32xf32>
    %cst_70 = arith.constant 0.000000e+00 : f32
    %310 = vector.broadcast %cst_70 : f32 to vector<4x32xf32>
    %311 = arith.select %15, %307, %310 : vector<4x32xi1>, vector<4x32xf32>
    %c2 = arith.constant 2 : index
    %c0_71 = arith.constant 0 : index
    %c0_72 = arith.constant 0 : index
    %312 = vector.load %arg5[%c2, %c0_71, %c0_72] : memref<10x4x32xf32, #tpu.memory_space<vmem>>, vector<1x4x32xf32>
    %313 = vector.shape_cast %312 : vector<1x4x32xf32> to vector<4x32xf32>
    %314 = vector.shape_cast %311 : vector<4x32xf32> to vector<1x4x32xf32>
    tpu.vector_store %arg5[%c2, %c0_71, %c0_72], %314 {strides = array<i32>} : memref<10x4x32xf32, #tpu.memory_space<vmem>>, vector<1x4x32xf32>,
    %315 = vector.extract_strided_slice %237 {offsets = [12, 0], sizes = [4, 128], strides = [1, 1]} : vector<32x128xf32> to vector<4x128xf32>
    %cst_73 = arith.constant dense<0.000000e+00> : vector<4x128xf32>
    %316 = tpu.matmul %308, %232, %cst_73 {dimension_numbers = #tpu.dot_dimension_numbers<[1], [0], [0], [1], [0, 0, 1, 1], [], []>} : vector<4x32xf32>, vector<32x128xf32>, vector<4x128xf32> -> vector<4x128xf32>
    %317 = arith.addf %315, %316 : vector<4x128xf32>
    %318 = arith.negf %317 : vector<4x128xf32>
    %319 = math.exp %318 : vector<4x128xf32>
    %cst_74 = arith.constant 1.000000e+00 : f32
    %320 = vector.broadcast %cst_74 : f32 to vector<4x128xf32>
    %321 = arith.addf %320, %319 : vector<4x128xf32>
    %322 = arith.divf %320, %321 : vector<4x128xf32>
    %323 = math.tanh %317 : vector<4x128xf32>
    %324 = vector.extract_strided_slice %322 {offsets = [0, 0], sizes = [4, 32], strides = [1, 1]} : vector<4x128xf32> to vector<4x32xf32>
    %325 = vector.extract_strided_slice %322 {offsets = [0, 32], sizes = [4, 32], strides = [1, 1]} : vector<4x128xf32> to vector<4x32xf32>
    %326 = vector.extract_strided_slice %323 {offsets = [0, 64], sizes = [4, 32], strides = [1, 1]} : vector<4x128xf32> to vector<4x32xf32>
    %327 = vector.extract_strided_slice %322 {offsets = [0, 96], sizes = [4, 32], strides = [1, 1]} : vector<4x128xf32> to vector<4x32xf32>
    %328 = arith.mulf %325, %309 : vector<4x32xf32>
    %329 = arith.mulf %324, %326 : vector<4x32xf32>
    %330 = arith.addf %328, %329 : vector<4x32xf32>
    %331 = math.tanh %330 : vector<4x32xf32>
    %332 = arith.mulf %327, %331 : vector<4x32xf32>
    %333 = arith.select %19, %332, %308 : vector<4x32xi1>, vector<4x32xf32>
    %334 = arith.select %19, %330, %309 : vector<4x32xi1>, vector<4x32xf32>
    %cst_75 = arith.constant 0.000000e+00 : f32
    %335 = vector.broadcast %cst_75 : f32 to vector<4x32xf32>
    %336 = arith.select %19, %332, %335 : vector<4x32xi1>, vector<4x32xf32>
    %c3 = arith.constant 3 : index
    %c0_76 = arith.constant 0 : index
    %c0_77 = arith.constant 0 : index
    %337 = vector.load %arg5[%c3, %c0_76, %c0_77] : memref<10x4x32xf32, #tpu.memory_space<vmem>>, vector<1x4x32xf32>
    %338 = vector.shape_cast %337 : vector<1x4x32xf32> to vector<4x32xf32>
    %339 = vector.shape_cast %336 : vector<4x32xf32> to vector<1x4x32xf32>
    tpu.vector_store %arg5[%c3, %c0_76, %c0_77], %339 {strides = array<i32>} : memref<10x4x32xf32, #tpu.memory_space<vmem>>, vector<1x4x32xf32>,
    %340 = vector.extract_strided_slice %237 {offsets = [16, 0], sizes = [4, 128], strides = [1, 1]} : vector<32x128xf32> to vector<4x128xf32>
    %cst_78 = arith.constant dense<0.000000e+00> : vector<4x128xf32>
    %341 = tpu.matmul %333, %232, %cst_78 {dimension_numbers = #tpu.dot_dimension_numbers<[1], [0], [0], [1], [0, 0, 1, 1], [], []>} : vector<4x32xf32>, vector<32x128xf32>, vector<4x128xf32> -> vector<4x128xf32>
    %342 = arith.addf %340, %341 : vector<4x128xf32>
    %343 = arith.negf %342 : vector<4x128xf32>
    %344 = math.exp %343 : vector<4x128xf32>
    %cst_79 = arith.constant 1.000000e+00 : f32
    %345 = vector.broadcast %cst_79 : f32 to vector<4x128xf32>
    %346 = arith.addf %345, %344 : vector<4x128xf32>
    %347 = arith.divf %345, %346 : vector<4x128xf32>
    %348 = math.tanh %342 : vector<4x128xf32>
    %349 = vector.extract_strided_slice %347 {offsets = [0, 0], sizes = [4, 32], strides = [1, 1]} : vector<4x128xf32> to vector<4x32xf32>
    %350 = vector.extract_strided_slice %347 {offsets = [0, 32], sizes = [4, 32], strides = [1, 1]} : vector<4x128xf32> to vector<4x32xf32>
    %351 = vector.extract_strided_slice %348 {offsets = [0, 64], sizes = [4, 32], strides = [1, 1]} : vector<4x128xf32> to vector<4x32xf32>
    %352 = vector.extract_strided_slice %347 {offsets = [0, 96], sizes = [4, 32], strides = [1, 1]} : vector<4x128xf32> to vector<4x32xf32>
    %353 = arith.mulf %350, %334 : vector<4x32xf32>
    %354 = arith.mulf %349, %351 : vector<4x32xf32>
    %355 = arith.addf %353, %354 : vector<4x32xf32>
    %356 = math.tanh %355 : vector<4x32xf32>
    %357 = arith.mulf %352, %356 : vector<4x32xf32>
    %358 = arith.select %23, %357, %333 : vector<4x32xi1>, vector<4x32xf32>
    %359 = arith.select %23, %355, %334 : vector<4x32xi1>, vector<4x32xf32>
    %cst_80 = arith.constant 0.000000e+00 : f32
    %360 = vector.broadcast %cst_80 : f32 to vector<4x32xf32>
    %361 = arith.select %23, %357, %360 : vector<4x32xi1>, vector<4x32xf32>
    %c4_81 = arith.constant 4 : index
    %c0_82 = arith.constant 0 : index
    %c0_83 = arith.constant 0 : index
    %362 = vector.load %arg5[%c4_81, %c0_82, %c0_83] : memref<10x4x32xf32, #tpu.memory_space<vmem>>, vector<1x4x32xf32>
    %363 = vector.shape_cast %362 : vector<1x4x32xf32> to vector<4x32xf32>
    %364 = vector.shape_cast %361 : vector<4x32xf32> to vector<1x4x32xf32>
    tpu.vector_store %arg5[%c4_81, %c0_82, %c0_83], %364 {strides = array<i32>} : memref<10x4x32xf32, #tpu.memory_space<vmem>>, vector<1x4x32xf32>,
    %365 = vector.extract_strided_slice %237 {offsets = [20, 0], sizes = [4, 128], strides = [1, 1]} : vector<32x128xf32> to vector<4x128xf32>
    %cst_84 = arith.constant dense<0.000000e+00> : vector<4x128xf32>
    %366 = tpu.matmul %358, %232, %cst_84 {dimension_numbers = #tpu.dot_dimension_numbers<[1], [0], [0], [1], [0, 0, 1, 1], [], []>} : vector<4x32xf32>, vector<32x128xf32>, vector<4x128xf32> -> vector<4x128xf32>
    %367 = arith.addf %365, %366 : vector<4x128xf32>
    %368 = arith.negf %367 : vector<4x128xf32>
    %369 = math.exp %368 : vector<4x128xf32>
    %cst_85 = arith.constant 1.000000e+00 : f32
    %370 = vector.broadcast %cst_85 : f32 to vector<4x128xf32>
    %371 = arith.addf %370, %369 : vector<4x128xf32>
    %372 = arith.divf %370, %371 : vector<4x128xf32>
    %373 = math.tanh %367 : vector<4x128xf32>
    %374 = vector.extract_strided_slice %372 {offsets = [0, 0], sizes = [4, 32], strides = [1, 1]} : vector<4x128xf32> to vector<4x32xf32>
    %375 = vector.extract_strided_slice %372 {offsets = [0, 32], sizes = [4, 32], strides = [1, 1]} : vector<4x128xf32> to vector<4x32xf32>
    %376 = vector.extract_strided_slice %373 {offsets = [0, 64], sizes = [4, 32], strides = [1, 1]} : vector<4x128xf32> to vector<4x32xf32>
    %377 = vector.extract_strided_slice %372 {offsets = [0, 96], sizes = [4, 32], strides = [1, 1]} : vector<4x128xf32> to vector<4x32xf32>
    %378 = arith.mulf %375, %359 : vector<4x32xf32>
    %379 = arith.mulf %374, %376 : vector<4x32xf32>
    %380 = arith.addf %378, %379 : vector<4x32xf32>
    %381 = math.tanh %380 : vector<4x32xf32>
    %382 = arith.mulf %377, %381 : vector<4x32xf32>
    %383 = arith.select %27, %382, %358 : vector<4x32xi1>, vector<4x32xf32>
    %384 = arith.select %27, %380, %359 : vector<4x32xi1>, vector<4x32xf32>
    %cst_86 = arith.constant 0.000000e+00 : f32
    %385 = vector.broadcast %cst_86 : f32 to vector<4x32xf32>
    %386 = arith.select %27, %382, %385 : vector<4x32xi1>, vector<4x32xf32>
    %c5 = arith.constant 5 : index
    %c0_87 = arith.constant 0 : index
    %c0_88 = arith.constant 0 : index
    %387 = vector.load %arg5[%c5, %c0_87, %c0_88] : memref<10x4x32xf32, #tpu.memory_space<vmem>>, vector<1x4x32xf32>
    %388 = vector.shape_cast %387 : vector<1x4x32xf32> to vector<4x32xf32>
    %389 = vector.shape_cast %386 : vector<4x32xf32> to vector<1x4x32xf32>
    tpu.vector_store %arg5[%c5, %c0_87, %c0_88], %389 {strides = array<i32>} : memref<10x4x32xf32, #tpu.memory_space<vmem>>, vector<1x4x32xf32>,
    %390 = vector.extract_strided_slice %237 {offsets = [24, 0], sizes = [4, 128], strides = [1, 1]} : vector<32x128xf32> to vector<4x128xf32>
    %cst_89 = arith.constant dense<0.000000e+00> : vector<4x128xf32>
    %391 = tpu.matmul %383, %232, %cst_89 {dimension_numbers = #tpu.dot_dimension_numbers<[1], [0], [0], [1], [0, 0, 1, 1], [], []>} : vector<4x32xf32>, vector<32x128xf32>, vector<4x128xf32> -> vector<4x128xf32>
    %392 = arith.addf %390, %391 : vector<4x128xf32>
    %393 = arith.negf %392 : vector<4x128xf32>
    %394 = math.exp %393 : vector<4x128xf32>
    %cst_90 = arith.constant 1.000000e+00 : f32
    %395 = vector.broadcast %cst_90 : f32 to vector<4x128xf32>
    %396 = arith.addf %395, %394 : vector<4x128xf32>
    %397 = arith.divf %395, %396 : vector<4x128xf32>
    %398 = math.tanh %392 : vector<4x128xf32>
    %399 = vector.extract_strided_slice %397 {offsets = [0, 0], sizes = [4, 32], strides = [1, 1]} : vector<4x128xf32> to vector<4x32xf32>
    %400 = vector.extract_strided_slice %397 {offsets = [0, 32], sizes = [4, 32], strides = [1, 1]} : vector<4x128xf32> to vector<4x32xf32>
    %401 = vector.extract_strided_slice %398 {offsets = [0, 64], sizes = [4, 32], strides = [1, 1]} : vector<4x128xf32> to vector<4x32xf32>
    %402 = vector.extract_strided_slice %397 {offsets = [0, 96], sizes = [4, 32], strides = [1, 1]} : vector<4x128xf32> to vector<4x32xf32>
    %403 = arith.mulf %400, %384 : vector<4x32xf32>
    %404 = arith.mulf %399, %401 : vector<4x32xf32>
    %405 = arith.addf %403, %404 : vector<4x32xf32>
    %406 = math.tanh %405 : vector<4x32xf32>
    %407 = arith.mulf %402, %406 : vector<4x32xf32>
    %408 = arith.select %31, %407, %383 : vector<4x32xi1>, vector<4x32xf32>
    %409 = arith.select %31, %405, %384 : vector<4x32xi1>, vector<4x32xf32>
    %cst_91 = arith.constant 0.000000e+00 : f32
    %410 = vector.broadcast %cst_91 : f32 to vector<4x32xf32>
    %411 = arith.select %31, %407, %410 : vector<4x32xi1>, vector<4x32xf32>
    %c6 = arith.constant 6 : index
    %c0_92 = arith.constant 0 : index
    %c0_93 = arith.constant 0 : index
    %412 = vector.load %arg5[%c6, %c0_92, %c0_93] : memref<10x4x32xf32, #tpu.memory_space<vmem>>, vector<1x4x32xf32>
    %413 = vector.shape_cast %412 : vector<1x4x32xf32> to vector<4x32xf32>
    %414 = vector.shape_cast %411 : vector<4x32xf32> to vector<1x4x32xf32>
    tpu.vector_store %arg5[%c6, %c0_92, %c0_93], %414 {strides = array<i32>} : memref<10x4x32xf32, #tpu.memory_space<vmem>>, vector<1x4x32xf32>,
    %415 = vector.extract_strided_slice %237 {offsets = [28, 0], sizes = [4, 128], strides = [1, 1]} : vector<32x128xf32> to vector<4x128xf32>
    %cst_94 = arith.constant dense<0.000000e+00> : vector<4x128xf32>
    %416 = tpu.matmul %408, %232, %cst_94 {dimension_numbers = #tpu.dot_dimension_numbers<[1], [0], [0], [1], [0, 0, 1, 1], [], []>} : vector<4x32xf32>, vector<32x128xf32>, vector<4x128xf32> -> vector<4x128xf32>
    %417 = arith.addf %415, %416 : vector<4x128xf32>
    %418 = arith.negf %417 : vector<4x128xf32>
    %419 = math.exp %418 : vector<4x128xf32>
    %cst_95 = arith.constant 1.000000e+00 : f32
    %420 = vector.broadcast %cst_95 : f32 to vector<4x128xf32>
    %421 = arith.addf %420, %419 : vector<4x128xf32>
    %422 = arith.divf %420, %421 : vector<4x128xf32>
    %423 = math.tanh %417 : vector<4x128xf32>
    %424 = vector.extract_strided_slice %422 {offsets = [0, 0], sizes = [4, 32], strides = [1, 1]} : vector<4x128xf32> to vector<4x32xf32>
    %425 = vector.extract_strided_slice %422 {offsets = [0, 32], sizes = [4, 32], strides = [1, 1]} : vector<4x128xf32> to vector<4x32xf32>
    %426 = vector.extract_strided_slice %423 {offsets = [0, 64], sizes = [4, 32], strides = [1, 1]} : vector<4x128xf32> to vector<4x32xf32>
    %427 = vector.extract_strided_slice %422 {offsets = [0, 96], sizes = [4, 32], strides = [1, 1]} : vector<4x128xf32> to vector<4x32xf32>
    %428 = arith.mulf %425, %409 : vector<4x32xf32>
    %429 = arith.mulf %424, %426 : vector<4x32xf32>
    %430 = arith.addf %428, %429 : vector<4x32xf32>
    %431 = math.tanh %430 : vector<4x32xf32>
    %432 = arith.mulf %427, %431 : vector<4x32xf32>
    %433 = arith.select %35, %432, %408 : vector<4x32xi1>, vector<4x32xf32>
    %434 = arith.select %35, %430, %409 : vector<4x32xi1>, vector<4x32xf32>
    %cst_96 = arith.constant 0.000000e+00 : f32
    %435 = vector.broadcast %cst_96 : f32 to vector<4x32xf32>
    %436 = arith.select %35, %432, %435 : vector<4x32xi1>, vector<4x32xf32>
    %c7 = arith.constant 7 : index
    %c0_97 = arith.constant 0 : index
    %c0_98 = arith.constant 0 : index
    %437 = vector.load %arg5[%c7, %c0_97, %c0_98] : memref<10x4x32xf32, #tpu.memory_space<vmem>>, vector<1x4x32xf32>
    %438 = vector.shape_cast %437 : vector<1x4x32xf32> to vector<4x32xf32>
    %439 = vector.shape_cast %436 : vector<4x32xf32> to vector<1x4x32xf32>
    tpu.vector_store %arg5[%c7, %c0_97, %c0_98], %439 {strides = array<i32>} : memref<10x4x32xf32, #tpu.memory_space<vmem>>, vector<1x4x32xf32>,
    %c4_99 = arith.constant 4 : index
    %c0_100 = arith.constant 0 : index
    %440 = vector.load %arg7[%c4_99, %c0_100] : memref<18x32xf32, #tpu.memory_space<vmem>>, vector<4x32xf32>
    tpu.vector_store %arg7[%c4_99, %c0_100], %433 {strides = array<i32>} : memref<18x32xf32, #tpu.memory_space<vmem>>, vector<4x32xf32>,
    %c12_101 = arith.constant 12 : index
    %c0_102 = arith.constant 0 : index
    %441 = vector.load %arg7[%c12_101, %c0_102] : memref<18x32xf32, #tpu.memory_space<vmem>>, vector<4x32xf32>
    tpu.vector_store %arg7[%c12_101, %c0_102], %434 {strides = array<i32>} : memref<18x32xf32, #tpu.memory_space<vmem>>, vector<4x32xf32>,
    %c128 = arith.constant 128 : index
    %c0_103 = arith.constant 0 : index
    %442 = vector.load %arg3[%c128, %c0_103] : memref<200x128xf32, #tpu.memory_space<vmem>>, vector<32x128xf32>
    %c160 = arith.constant 160 : index
    %c0_104 = arith.constant 0 : index
    %443 = vector.load %arg3[%c160, %c0_104] : memref<200x128xf32, #tpu.memory_space<vmem>>, vector<32x128xf32>
    %c192 = arith.constant 192 : index
    %c0_105 = arith.constant 0 : index
    %444 = vector.load %arg3[%c192, %c0_105] : memref<200x128xf32, #tpu.memory_space<vmem>>, vector<1x128xf32>
    %cst_106 = arith.constant dense<0.000000e+00> : vector<4x128xf32>
    %445 = tpu.matmul %433, %442, %cst_106 {dimension_numbers = #tpu.dot_dimension_numbers<[1], [0], [0], [1], [0, 0, 1, 1], [], []>} : vector<4x32xf32>, vector<32x128xf32>, vector<4x128xf32> -> vector<4x128xf32>
    %446 = vector.broadcast %444 : vector<1x128xf32> to vector<4x128xf32>
    %447 = arith.addf %445, %446 : vector<4x128xf32>
    %448 = vector.extract_strided_slice %1 {offsets = [16, 0], sizes = [1, 32], strides = [1, 1]} : vector<18x32xf32> to vector<1x32xf32>
    %449 = vector.extract_strided_slice %1 {offsets = [17, 0], sizes = [1, 32], strides = [1, 1]} : vector<18x32xf32> to vector<1x32xf32>
    %450 = vector.extract_strided_slice %447 {offsets = [0, 0], sizes = [1, 128], strides = [1, 1]} : vector<4x128xf32> to vector<1x128xf32>
    %cst_107 = arith.constant dense<0.000000e+00> : vector<1x128xf32>
    %451 = tpu.matmul %448, %443, %cst_107 {dimension_numbers = #tpu.dot_dimension_numbers<[1], [0], [0], [1], [0, 0, 1, 1], [], []>} : vector<1x32xf32>, vector<32x128xf32>, vector<1x128xf32> -> vector<1x128xf32>
    %452 = arith.addf %450, %451 : vector<1x128xf32>
    %453 = arith.negf %452 : vector<1x128xf32>
    %454 = math.exp %453 : vector<1x128xf32>
    %cst_108 = arith.constant 1.000000e+00 : f32
    %455 = vector.broadcast %cst_108 : f32 to vector<1x128xf32>
    %456 = arith.addf %455, %454 : vector<1x128xf32>
    %457 = arith.divf %455, %456 : vector<1x128xf32>
    %458 = math.tanh %452 : vector<1x128xf32>
    %459 = vector.extract_strided_slice %457 {offsets = [0, 0], sizes = [1, 32], strides = [1, 1]} : vector<1x128xf32> to vector<1x32xf32>
    %460 = vector.extract_strided_slice %457 {offsets = [0, 32], sizes = [1, 32], strides = [1, 1]} : vector<1x128xf32> to vector<1x32xf32>
    %461 = vector.extract_strided_slice %458 {offsets = [0, 64], sizes = [1, 32], strides = [1, 1]} : vector<1x128xf32> to vector<1x32xf32>
    %462 = vector.extract_strided_slice %457 {offsets = [0, 96], sizes = [1, 32], strides = [1, 1]} : vector<1x128xf32> to vector<1x32xf32>
    %463 = arith.mulf %460, %449 : vector<1x32xf32>
    %464 = arith.mulf %459, %461 : vector<1x32xf32>
    %465 = arith.addf %463, %464 : vector<1x32xf32>
    %466 = math.tanh %465 : vector<1x32xf32>
    %467 = arith.mulf %462, %466 : vector<1x32xf32>
    %c0_109 = arith.constant 0 : index
    %c0_110 = arith.constant 0 : index
    %468 = vector.load %arg6[%c0_109, %c0_110] : memref<4x32xf32, #tpu.memory_space<vmem>>, vector<1x32xf32>
    tpu.vector_store %arg6[%c0_109, %c0_110], %467 {strides = array<i32>} : memref<4x32xf32, #tpu.memory_space<vmem>>, vector<1x32xf32>,
    %469 = vector.extract_strided_slice %447 {offsets = [1, 0], sizes = [1, 128], strides = [1, 1]} : vector<4x128xf32> to vector<1x128xf32>
    %cst_111 = arith.constant dense<0.000000e+00> : vector<1x128xf32>
    %470 = tpu.matmul %467, %443, %cst_111 {dimension_numbers = #tpu.dot_dimension_numbers<[1], [0], [0], [1], [0, 0, 1, 1], [], []>} : vector<1x32xf32>, vector<32x128xf32>, vector<1x128xf32> -> vector<1x128xf32>
    %471 = arith.addf %469, %470 : vector<1x128xf32>
    %472 = arith.negf %471 : vector<1x128xf32>
    %473 = math.exp %472 : vector<1x128xf32>
    %cst_112 = arith.constant 1.000000e+00 : f32
    %474 = vector.broadcast %cst_112 : f32 to vector<1x128xf32>
    %475 = arith.addf %474, %473 : vector<1x128xf32>
    %476 = arith.divf %474, %475 : vector<1x128xf32>
    %477 = math.tanh %471 : vector<1x128xf32>
    %478 = vector.extract_strided_slice %476 {offsets = [0, 0], sizes = [1, 32], strides = [1, 1]} : vector<1x128xf32> to vector<1x32xf32>
    %479 = vector.extract_strided_slice %476 {offsets = [0, 32], sizes = [1, 32], strides = [1, 1]} : vector<1x128xf32> to vector<1x32xf32>
    %480 = vector.extract_strided_slice %477 {offsets = [0, 64], sizes = [1, 32], strides = [1, 1]} : vector<1x128xf32> to vector<1x32xf32>
    %481 = vector.extract_strided_slice %476 {offsets = [0, 96], sizes = [1, 32], strides = [1, 1]} : vector<1x128xf32> to vector<1x32xf32>
    %482 = arith.mulf %479, %465 : vector<1x32xf32>
    %483 = arith.mulf %478, %480 : vector<1x32xf32>
    %484 = arith.addf %482, %483 : vector<1x32xf32>
    %485 = math.tanh %484 : vector<1x32xf32>
    %486 = arith.mulf %481, %485 : vector<1x32xf32>
    %c1_113 = arith.constant 1 : index
    %c0_114 = arith.constant 0 : index
    %487 = vector.load %arg6[%c1_113, %c0_114] : memref<4x32xf32, #tpu.memory_space<vmem>>, vector<1x32xf32>
    tpu.vector_store %arg6[%c1_113, %c0_114], %486 {strides = array<i32>} : memref<4x32xf32, #tpu.memory_space<vmem>>, vector<1x32xf32>,
    %488 = vector.extract_strided_slice %447 {offsets = [2, 0], sizes = [1, 128], strides = [1, 1]} : vector<4x128xf32> to vector<1x128xf32>
    %cst_115 = arith.constant dense<0.000000e+00> : vector<1x128xf32>
    %489 = tpu.matmul %486, %443, %cst_115 {dimension_numbers = #tpu.dot_dimension_numbers<[1], [0], [0], [1], [0, 0, 1, 1], [], []>} : vector<1x32xf32>, vector<32x128xf32>, vector<1x128xf32> -> vector<1x128xf32>
    %490 = arith.addf %488, %489 : vector<1x128xf32>
    %491 = arith.negf %490 : vector<1x128xf32>
    %492 = math.exp %491 : vector<1x128xf32>
    %cst_116 = arith.constant 1.000000e+00 : f32
    %493 = vector.broadcast %cst_116 : f32 to vector<1x128xf32>
    %494 = arith.addf %493, %492 : vector<1x128xf32>
    %495 = arith.divf %493, %494 : vector<1x128xf32>
    %496 = math.tanh %490 : vector<1x128xf32>
    %497 = vector.extract_strided_slice %495 {offsets = [0, 0], sizes = [1, 32], strides = [1, 1]} : vector<1x128xf32> to vector<1x32xf32>
    %498 = vector.extract_strided_slice %495 {offsets = [0, 32], sizes = [1, 32], strides = [1, 1]} : vector<1x128xf32> to vector<1x32xf32>
    %499 = vector.extract_strided_slice %496 {offsets = [0, 64], sizes = [1, 32], strides = [1, 1]} : vector<1x128xf32> to vector<1x32xf32>
    %500 = vector.extract_strided_slice %495 {offsets = [0, 96], sizes = [1, 32], strides = [1, 1]} : vector<1x128xf32> to vector<1x32xf32>
    %501 = arith.mulf %498, %484 : vector<1x32xf32>
    %502 = arith.mulf %497, %499 : vector<1x32xf32>
    %503 = arith.addf %501, %502 : vector<1x32xf32>
    %504 = math.tanh %503 : vector<1x32xf32>
    %505 = arith.mulf %500, %504 : vector<1x32xf32>
    %c2_117 = arith.constant 2 : index
    %c0_118 = arith.constant 0 : index
    %506 = vector.load %arg6[%c2_117, %c0_118] : memref<4x32xf32, #tpu.memory_space<vmem>>, vector<1x32xf32>
    tpu.vector_store %arg6[%c2_117, %c0_118], %505 {strides = array<i32>} : memref<4x32xf32, #tpu.memory_space<vmem>>, vector<1x32xf32>,
    %507 = vector.extract_strided_slice %447 {offsets = [3, 0], sizes = [1, 128], strides = [1, 1]} : vector<4x128xf32> to vector<1x128xf32>
    %cst_119 = arith.constant dense<0.000000e+00> : vector<1x128xf32>
    %508 = tpu.matmul %505, %443, %cst_119 {dimension_numbers = #tpu.dot_dimension_numbers<[1], [0], [0], [1], [0, 0, 1, 1], [], []>} : vector<1x32xf32>, vector<32x128xf32>, vector<1x128xf32> -> vector<1x128xf32>
    %509 = arith.addf %507, %508 : vector<1x128xf32>
    %510 = arith.negf %509 : vector<1x128xf32>
    %511 = math.exp %510 : vector<1x128xf32>
    %cst_120 = arith.constant 1.000000e+00 : f32
    %512 = vector.broadcast %cst_120 : f32 to vector<1x128xf32>
    %513 = arith.addf %512, %511 : vector<1x128xf32>
    %514 = arith.divf %512, %513 : vector<1x128xf32>
    %515 = math.tanh %509 : vector<1x128xf32>
    %516 = vector.extract_strided_slice %514 {offsets = [0, 0], sizes = [1, 32], strides = [1, 1]} : vector<1x128xf32> to vector<1x32xf32>
    %517 = vector.extract_strided_slice %514 {offsets = [0, 32], sizes = [1, 32], strides = [1, 1]} : vector<1x128xf32> to vector<1x32xf32>
    %518 = vector.extract_strided_slice %515 {offsets = [0, 64], sizes = [1, 32], strides = [1, 1]} : vector<1x128xf32> to vector<1x32xf32>
    %519 = vector.extract_strided_slice %514 {offsets = [0, 96], sizes = [1, 32], strides = [1, 1]} : vector<1x128xf32> to vector<1x32xf32>
    %520 = arith.mulf %517, %503 : vector<1x32xf32>
    %521 = arith.mulf %516, %518 : vector<1x32xf32>
    %522 = arith.addf %520, %521 : vector<1x32xf32>
    %523 = math.tanh %522 : vector<1x32xf32>
    %524 = arith.mulf %519, %523 : vector<1x32xf32>
    %c3_121 = arith.constant 3 : index
    %c0_122 = arith.constant 0 : index
    %525 = vector.load %arg6[%c3_121, %c0_122] : memref<4x32xf32, #tpu.memory_space<vmem>>, vector<1x32xf32>
    tpu.vector_store %arg6[%c3_121, %c0_122], %524 {strides = array<i32>} : memref<4x32xf32, #tpu.memory_space<vmem>>, vector<1x32xf32>,
    %c16_123 = arith.constant 16 : index
    %c0_124 = arith.constant 0 : index
    %526 = vector.load %arg7[%c16_123, %c0_124] : memref<18x32xf32, #tpu.memory_space<vmem>>, vector<1x32xf32>
    tpu.vector_store %arg7[%c16_123, %c0_124], %524 {strides = array<i32>} : memref<18x32xf32, #tpu.memory_space<vmem>>, vector<1x32xf32>,
    %c17 = arith.constant 17 : index
    %c0_125 = arith.constant 0 : index
    %527 = vector.load %arg7[%c17, %c0_125] : memref<18x32xf32, #tpu.memory_space<vmem>>, vector<1x32xf32>
    tpu.vector_store %arg7[%c17, %c0_125], %522 {strides = array<i32>} : memref<18x32xf32, #tpu.memory_space<vmem>>, vector<1x32xf32>,
    return
  }
  func.func @transform_0(%arg0: i32) -> (i32, i32) {
    %c0_i32 = arith.constant 0 : i32
    %c0_i32_0 = arith.constant 0 : i32
    %c0_i32_1 = arith.constant 0 : i32
    return %c0_i32, %c0_i32_0 : i32, i32
  }
  func.func @transform_1(%arg0: i32) -> (i32, i32) {
    %c0_i32 = arith.constant 0 : i32
    %c0_i32_0 = arith.constant 0 : i32
    %c0_i32_1 = arith.constant 0 : i32
    return %c0_i32, %c0_i32_0 : i32, i32
  }
  func.func @transform_2(%arg0: i32) -> (i32, i32) {
    %c0_i32 = arith.constant 0 : i32
    %c0_i32_0 = arith.constant 0 : i32
    %c0_i32_1 = arith.constant 0 : i32
    return %c0_i32, %c0_i32_0 : i32, i32
  }
  func.func @transform_3(%arg0: i32) -> (i32, i32) {
    %c0_i32 = arith.constant 0 : i32
    %c0_i32_0 = arith.constant 0 : i32
    %c0_i32_1 = arith.constant 0 : i32
    return %c0_i32, %c0_i32_0 : i32, i32
  }
  func.func @transform_4(%arg0: i32) -> (i32, i32, i32) {
    %c0_i32 = arith.constant 0 : i32
    %c0_i32_0 = arith.constant 0 : i32
    %c0_i32_1 = arith.constant 0 : i32
    %c0_i32_2 = arith.constant 0 : i32
    return %c0_i32, %c0_i32_0, %c0_i32_1 : i32, i32, i32
  }
  func.func @transform_5(%arg0: i32) -> (i32, i32) {
    %c0_i32 = arith.constant 0 : i32
    %c0_i32_0 = arith.constant 0 : i32
    %c0_i32_1 = arith.constant 0 : i32
    return %c0_i32, %c0_i32_0 : i32, i32
  }
  func.func @transform_6(%arg0: i32) -> (i32, i32) {
    %c0_i32 = arith.constant 0 : i32
    %c0_i32_0 = arith.constant 0 : i32
    %c0_i32_1 = arith.constant 0 : i32
    return %c0_i32, %c0_i32_0 : i32, i32
  }
}

</mosaic_0001>

<bundles_post_ra>
// kernel: hier_attn_encoder_forward.1
= control target key start
LH: loop header
LB: loop body
LE: loop exit
PB: predicated region body
PF: predicated region fallthrough
CT: control target
= control target key end

     0   :  { %12 = vsyncpa [#allocation4], 0  ;;  %vm93_vm0 = vcmask 130048   ;;  %v3564_v3 = vmov 0.0|0.0   ;;  %vm3565_vm1 = vmmov 0   ;;  %v3566_v10 = vmov 0.0   ;;  %s4330_s0 = inlined_call_operand.vmem [shape: f32[32,16], index: 0, kind: input, shape index: {}]   ;;  %s4331_s1 = inlined_call_operand.vmem [shape: s32[4,1], index: 1, kind: input, shape index: {}]   ;;  %s4332_s2 = inlined_call_operand.vmem [shape: f32[200,128], index: 2, kind: input, shape index: {}]   ;;  %s4333_s3 = inlined_call_operand.vmem [shape: f32[18,32], index: 3, kind: input, shape index: {}, may-alias: {3,6}]   ;;  %s4334_s4 = inlined_call_operand.hbm [shape: f32[10,4,32], index: 4, kind: output, shape index: {0}]   ;;  %s4335_s5 = inlined_call_operand.hbm [shape: f32[4,32], index: 5, kind: output, shape index: {1}]   ;;  %s4336_s6 = inlined_call_operand.vmem [shape: f32[18,32], index: 6, kind: output, shape index: {2}, may-alias: {3,6}]  }
   0x1   :  { %v78_v0 = vld [vmem:[%s4332_s2] sm:$0xff]  ;;  %v79_v1 = vld [vmem:[%s4332_s2 + $0x8] sm:$0xff]  ;;  %v80_v2 = vld [vmem:[%s4332_s2 + $0x10] sm:$0xff]  ;;  %3210 = vmatprep.subr.bf16.mxu1 %v3564_v3  ;;  %2969 = vmatprep.mubr.msk.f32.mxu1 %vm3565_vm1, %v3566_v10 }
   0x2   :  { %v3206_v4 = vpack.c.bf16 %v79_v1, %v78_v0  ;;  %v81_v5 = vld [vmem:[%s4332_s2 + $0x18] sm:$0xff]  ;;  %v85_v6 = vld [vmem:[%s4330_s0] sm:$0xff]  ;;  %v83_v9 = vld [vmem:[%s4332_s2 + $0x28] sm:$0xff] }
   0x3   :  { %v3625_v7 = vpack.c.bf16 %v81_v5, %v80_v2  ;;  %2955 = vmatprep.mubr.msk.f32.mxu0 %vm93_vm0, %v85_v6  ;;  %v82_v8 = vld [vmem:[%s4332_s2 + $0x20] sm:$0xff] }
   0x4   :  { %3207 = vmatprep.subr.bf16.mxu0 %v3206_v4 }
   0x5   :  { %13 = vsyncpa [#allocation6], 0  ;;  %3212 = vmatpush3.bf16.msra.mxu1 %v3625_v7  ;;  %3209 = vmatpush3.bf16.msra.mxu0 %v3206_v4  ;;  %v86_v11 = vld [vmem:[%s4330_s0 + $0x8] sm:$0xff]  ;;  %v3640_v12 = vpack.c.bf16 %v83_v9, %v82_v8  ;;  %v3649_v13 = vld [vmem:[%s4333_s3] sm:$0xff]  ;;  %vm191_vm2 = vcmask 261120   ;;  %v3567_v21 = vmov 0  }
   0x6   :  { %3213 = vmatprep.subr.bf16.mxu1 %v3564_v3  ;;  %3216 = vmatprep.subr.bf16.mxu0 %v3564_v3  ;;  %v3667_v14 = vld [vmem:[%s4332_s2 + $0x30] ss:$0 sm:$0xff]  ;;  %s3568_s17 = smov 64   ;;  %v3678_v23 = vld [vmem:[%s4333_s3 + $0x8] sm:$0xff]  ;;  %s3569_s20 = smov 32   ;;  %v88_v37 = vld [vmem:[%s4330_s0 + $0x18] sm:$0xff] }
   0x7   :  { %3354 = vset.pattern.permute.xlu1 %v3567_v21  ;;  %3355 = vset.pattern.permute.xlu0 %v3567_v21  ;;  %v3685_v27 = vld [vmem:[%s4331_s1] sm:$0xf]  ;;  %s3570_s23 = smov 96   ;;  %v87_v36 = vld [vmem:[%s4330_s0 + $0x10] sm:$0xff]  ;;  %vm27_vm6 = vcmask 257024   ;;  %s3571_s1 = smov [#allocation3]  }
   0x8   :  { %2956 = vmatmul.mubr.msk.f32.vlgmr.msra.gmra.mrb[0].mxu0 %vm93_vm0, %v86_v11  ;;  %vm30_vm3 = vcmp.gt.s32.totalorder %v3685_v27, 0  ;;  %vm36_vm5 = vcmp.gt.s32.totalorder %v3685_v27, 1  ;;  %28 = vst.msk [vmem:[#allocation3 + $0x20] sm:$0xf] %vm27_vm6, %v3566_v10  ;;  %29 = vst.msk [vmem:[#allocation3 + $0x24] sm:$0xf] %vm27_vm6, %v3566_v10 }
   0x9   :  { %3215 = vmatpush3.bf16.msra.mxu1 %v3640_v12  ;;  %3218 = vmatpush3.bf16.msra.mxu0 %v3625_v7  ;;  %v31_v31 = vsel %vm30_vm3, 1, %v3567_v21  ;;  %v37_v58 = vsel %vm36_vm5, 1, %v3567_v21  ;;  %vm42_vm8 = vcmp.gt.s32.totalorder %v3685_v27, 2  ;;  %vm48_vm10 = vcmp.gt.s32.totalorder %v3685_v27, 3  ;;  %s2751_s24 = sshll.u32 %s3571_s1, 4  ;;  %s2752_s24 = int_to_ptr.vmem [resolvable:$true] %s2751_s24 }
   0xa   :  { %3219 = vmatprep.subr.bf16.mxu0 %v3564_v3  ;;  %3222 = vmatprep.subr.bf16.mxu1 %v3564_v3  ;;  %vm54_vm12 = vcmp.gt.s32.totalorder %v3685_v27, 4  ;;  %vm60_vm14 = vcmp.gt.s32.totalorder %v3685_v27, 5  ;;  %vm72_vm5 = vcmp.gt.s32.totalorder %v3685_v27, 7  ;;  %p3521_p1 = scmp.lt.s32.totalorder %s2752_s24, %s2752_s24 }
   0xb   :  { %2958 = vmatprep.mubr.msk.f32.mxu0 %vm93_vm0, %v87_v36 }
   0xc   :  { %2970 = vmatmul.mubr.msk.f32.vlgmr.msra.gmra.mrb[0].mxu1 %vm191_vm2, %v3649_v13  ;;  %2959 = vmatmul.mubr.msk.f32.gmra.mrb[2].mxu0 %vm93_vm0, %v88_v37  ;;  %vm66_vm0 = vcmp.gt.s32.totalorder %v3685_v27, 6 }
   0xd   :  { %3221 = vmatpush3.bf16.msra.mxu0 %v3640_v12  ;;  %3224 = vmatpush3.bf16.msra.mxu1 %v3625_v7 }
   0xe   :  { %3225 = vmatprep.subr.bf16.mxu1 %v3564_v3  ;;  %2991 = vmatprep.mubr.msk.f32.mxu1 %vm3565_vm1, %v3566_v10 }
   0xf   :  { %3228 = vmatprep.subr.bf16.mxu0 %v3564_v3  ;;  %2980 = vmatprep.mubr.msk.f32.mxu0 %vm3565_vm1, %v3566_v10 }
  0x11   :  { %3227 = vmatpush3.bf16.msra.mxu1 %v3640_v12 }
  0x12   :  { %3234 = vmatprep.subr.bf16.mxu1 %v3564_v3 }
  0xdb   :  { %v3669_v15 = vpop.f32.mrb[0].mxu0 }
  0xdc   :  { %v172_v16 = vpop.f32.mrb[1].mxu0 }
  0xdd   :  { %v173_v17 = vadd.f32 %v3667_v14, %v172_v16 }
  0xdf   :  { %v261_v18 = vpop.f32.mrb[0].mxu1  ;;  %v3712_v44 = vpop.f32.mrb[2].mxu0 }
  0xe0   :  { %v265_v19 = vadd.f32 %v261_v18, %v173_v17  ;;  %v2971_v20 = vpop.f32.mrb[1].mxu1  ;;  %v3714_v45 = vpop.f32.mrb[3].mxu0 }
  0xe1   :  { %v178_v20 = vadd.f32 %v3669_v15, %v3667_v14 }
  0xe2   :  { %3356 = vtanh.f32 %v265_v19  ;;  %v2786_v24 = vmul.f32 -1.442695, %v265_v19  ;;  %v43_v19 = vsel %vm42_vm8, 1, %v3567_v21 }
  0xe4   :  { %3358 = vpow2.f32 %v2786_v24 }
  0xec   :  { %v3357_v22 = vpop.eup %3356 }
  0xed   :  { %279 = vrot.lane.b32.xlu0 %v3357_v22, %s3568_s17 }
  0xee   :  { %v3359_v25 = vpop.eup %3358 }
  0xef   :  { %v269_v26 = vadd.f32 1.0, %v3359_v25 }
  0xf1   :  { %274 = vrot.lane.b32.xlu0 %v3678_v23, %s3569_s20  ;;  %3360 = vrcp.f32 %v269_v26 }
  0xfb   :  { %v3361_v28 = vpop.eup %3360 }
 0x15f   :  { %v280_v29 = vpop.permute.xlu0 %279 }
 0x160   :  { %v282_v30 = vmul.f32 %v3361_v28, %v280_v29 }
 0x162   :  { %284 = vrot.lane.b32.xlu1 %v282_v30, %s3569_s20 }
 0x163   :  { %v275_v32 = vpop.permute.xlu0 %274 }
 0x164   :  { %v277_v33 = vmul.f32 %v3361_v28, %v275_v32 }
 0x166   :  { %33 = vperm.xlu1 %3354, %v31_v31  }
 0x16a   :  { %294 = vrot.lane.b32.xlu1 %v3649_v13, %s3570_s23 }
 0x1d4   :  { %v285_v34 = vpop.permute.xlu1 %284 }
 0x1d5   :  { %v287_v35 = vadd.f32 %v285_v34, %v277_v33 }
 0x1d7   :  { %3362 = vtanh.f32 %v287_v35 }
 0x1e1   :  { %v3363_v38 = vpop.eup %3362 }
 0x1e2   :  { %290 = vrot.lane.b32.xlu0 %v3363_v38, %s3568_s17 }
 0x1e5   :  { %v3703_v39 = vpop.permute.xlu1 %33 }
 0x1e6   :  { %vm35_vm4 = vcmp.eq.s32.totalorder %v3703_v39, 1 }
 0x1e7   :  { %v298_v59 = vsel %vm35_vm4, %v287_v35, %v275_v32 }
 0x1e8   :  { %v392_v60 = vrot.slane %v298_v59, 4 }
 0x1e9   :  { %v295_v41 = vpop.permute.xlu1 %294 }
 0x254   :  { %v291_v40 = vpop.permute.xlu0 %290 }
 0x255   :  { %v3705_v42 = vmul.f32 %v3361_v28, %v291_v40 }
 0x257   :  { %v297_v43 = vsel %vm35_vm4, %v3705_v42, %v295_v41 }
 0x258   :  { %306 = vrot.lane.b32.xlu0 %v297_v43, %s3569_s20 }
 0x2ca   :  { %v307_v46 = vpop.permute.xlu0 %306 }
 0x2cb   :  { %2981 = vmatmul.mubr.msk.f32.vlgmr.msra.gmra.mrb[4].mxu0 %vm191_vm2, %v307_v46 }
 0x2cc   :  { %3230 = vmatpush3.bf16.msra.mxu0 %v3625_v7  ;;  %3002 = vmatprep.mubr.msk.f32.mxu0 %vm3565_vm1, %v3566_v10 }
 0x2cd   :  { %3231 = vmatprep.subr.bf16.mxu0 %v3564_v3 }
 0x2d0   :  { %3233 = vmatpush3.bf16.msra.mxu0 %v3640_v12 }
 0x2d1   :  { %3240 = vmatprep.subr.bf16.mxu0 %v3564_v3 }
 0x39e   :  { %v376_v47 = vpop.f32.mrb[4].mxu0 }
 0x39f   :  { %v381_v48 = vrot.slane %v376_v47, 4  ;;  %v2982_v49 = vpop.f32.mrb[5].mxu0 }
 0x3a1   :  { %v383_v50 = vadd.f32 %v381_v48, %v173_v17 }
 0x3a3   :  { %3364 = vtanh.f32 %v383_v50  ;;  %v2788_v52 = vmul.f32 -1.442695, %v383_v50 }
 0x3a5   :  { %3366 = vpow2.f32 %v2788_v52 }
 0x3ad   :  { %v3365_v51 = vpop.eup %3364 }
 0x3ae   :  { %396 = vrot.lane.b32.xlu1 %v3365_v51, %s3568_s17 }
 0x3af   :  { %v3367_v53 = vpop.eup %3366 }
 0x3b0   :  { %v387_v54 = vadd.f32 1.0, %v3367_v53 }
 0x3b2   :  { %3368 = vrcp.f32 %v387_v54 }
 0x3bc   :  { %v3369_v55 = vpop.eup %3368 }
 0x3bd   :  { %v394_v61 = vmul.f32 %v3369_v55, %v392_v60 }
 0x420   :  { %v397_v56 = vpop.permute.xlu1 %396 }
 0x421   :  { %v399_v57 = vmul.f32 %v3369_v55, %v397_v56 }
 0x423   :  { %401 = vrot.lane.b32.xlu0 %v399_v57, %s3569_s20 }
 0x427   :  { %39 = vperm.xlu0 %3355, %v37_v58  }
 0x42b   :  { %423 = vrot.lane.b32.xlu0 %v298_v59, %s3570_s23  ;;  %v49_v59 = vsel %vm48_vm10, 1, %v3567_v21 }
 0x495   :  { %v402_v62 = vpop.permute.xlu0 %401 }
 0x496   :  { %v404_v63 = vadd.f32 %v402_v62, %v394_v61 }
 0x498   :  { %3370 = vtanh.f32 %v404_v63  ;;  %v419_v5 = vrot.slane %v404_v63, 4 }
 0x4a2   :  { %v3371_v0 = vpop.eup %3370 }
 0x4a3   :  { %407 = vrot.lane.b32.xlu1 %v3371_v0, %s3568_s17 }
 0x4a6   :  { %v3737_v6 = vpop.permute.xlu0 %39 }
 0x4a7   :  { %vm41_vm7 = vcmp.eq.s32.totalorder %v3737_v6, 1 }
 0x4aa   :  { %v424_v16 = vpop.permute.xlu0 %423 }
 0x515   :  { %v408_v1 = vpop.permute.xlu1 %407 }
 0x516   :  { %v410_v2 = vmul.f32 %v3369_v55, %v408_v1 }
 0x518   :  { %v412_v4 = vrot.slane %v410_v2, 4 }
 0x51a   :  { %413 = vrot.lane.b32.xlu1 %v412_v4, %s3569_s20 }
 0x51e   :  { %420 = vrot.lane.b32.xlu1 %v419_v5, %s3570_s23 }
 0x58c   :  { %v414_v8 = vpop.permute.xlu1 %413 }
 0x58d   :  { %v417_v9 = vsel %vm41_vm7, %v414_v8, %v307_v46  ;;  %v427_v11 = vsel %vm41_vm7, %v414_v8, 0.0 }
 0x58e   :  { %428 = vst.msk [vmem:[#allocation2 + $0x4] sm:$0xf] %vm27_vm6, %v427_v11  ;;  %2992 = vmatmul.mubr.msk.f32.vlgmr.msra.gmra.mrb[2].mxu1 %vm191_vm2, %v417_v9 }
 0x58f   :  { %3236 = vmatpush3.bf16.msra.mxu1 %v3625_v7  ;;  %3013 = vmatprep.mubr.msk.f32.mxu1 %vm3565_vm1, %v3566_v10 }
 0x590   :  { %v421_v17 = vpop.permute.xlu1 %420  ;;  %3237 = vmatprep.subr.bf16.mxu1 %v3564_v3 }
 0x591   :  { %v426_v18 = vsel %vm41_vm7, %v421_v17, %v424_v16 }
 0x592   :  { %511 = vrot.lane.b32.xlu0 %v426_v18, %s3569_s20 }
 0x593   :  { %3239 = vmatpush3.bf16.msra.mxu1 %v3640_v12 }
 0x594   :  { %3246 = vmatprep.subr.bf16.mxu1 %v3564_v3 }
 0x596   :  { %45 = vperm.xlu0 %3355, %v43_v19  }
 0x59a   :  { %531 = vrot.lane.b32.xlu0 %v417_v9, %s3570_s23 }
 0x604   :  { %v512_v34 = vpop.permute.xlu0 %511 }
 0x615   :  { %v3763_v38 = vpop.permute.xlu0 %45 }
 0x616   :  { %vm47_vm9 = vcmp.eq.s32.totalorder %v3763_v38, 1 }
 0x619   :  { %v532_v43 = vpop.permute.xlu0 %531 }
 0x661   :  { %v498_v22 = vpop.f32.mrb[2].mxu1 }
 0x662   :  { %v502_v24 = vadd.f32 %v498_v22, %v178_v20  ;;  %v2993_v25 = vpop.f32.mrb[3].mxu1  ;;  %v55_v22 = vsel %vm54_vm12, 1, %v3567_v21 }
 0x664   :  { %3372 = vtanh.f32 %v502_v24  ;;  %v2790_v28 = vmul.f32 -1.442695, %v502_v24  ;;  %v183_v24 = vadd.f32 %v3667_v14, %v3714_v45 }
 0x666   :  { %3374 = vpow2.f32 %v2790_v28 }
 0x66e   :  { %v3373_v26 = vpop.eup %3372 }
 0x66f   :  { %516 = vrot.lane.b32.xlu1 %v3373_v26, %s3568_s17 }
 0x670   :  { %v3375_v29 = vpop.eup %3374 }
 0x671   :  { %v506_v30 = vadd.f32 1.0, %v3375_v29 }
 0x673   :  { %3376 = vrcp.f32 %v506_v30 }
 0x67d   :  { %v3377_v31 = vpop.eup %3376 }
 0x67e   :  { %v514_v35 = vmul.f32 %v3377_v31, %v512_v34 }
 0x6e1   :  { %v517_v32 = vpop.permute.xlu1 %516 }
 0x6e2   :  { %v519_v33 = vmul.f32 %v3377_v31, %v517_v32 }
 0x6e4   :  { %521 = vrot.lane.b32.xlu1 %v519_v33, %s3569_s20 }
 0x756   :  { %v522_v15 = vpop.permute.xlu1 %521 }
 0x757   :  { %v524_v36 = vadd.f32 %v522_v15, %v514_v35 }
 0x759   :  { %3378 = vtanh.f32 %v524_v36  ;;  %v535_v60 = vsel %vm47_vm9, %v524_v36, %v512_v34 }
 0x75a   :  { %v629_v61 = vrot.slane %v535_v60, 4 }
 0x763   :  { %v3379_v37 = vpop.eup %3378 }
 0x764   :  { %527 = vrot.lane.b32.xlu1 %v3379_v37, %s3568_s17 }
 0x7d6   :  { %v528_v40 = vpop.permute.xlu1 %527 }
 0x7d7   :  { %v3765_v41 = vmul.f32 %v3377_v31, %v528_v40 }
 0x7d9   :  { %v534_v46 = vsel %vm47_vm9, %v3765_v41, %v532_v43 }
 0x7da   :  { %543 = vrot.lane.b32.xlu1 %v534_v46, %s3569_s20 }
 0x84c   :  { %v544_v47 = vpop.permute.xlu1 %543 }
 0x84d   :  { %3003 = vmatmul.mubr.msk.f32.vlgmr.msra.gmra.mrb[6].mxu0 %vm191_vm2, %v544_v47 }
 0x84e   :  { %3242 = vmatpush3.bf16.msra.mxu0 %v3625_v7  ;;  %3024 = vmatprep.mubr.msk.f32.mxu0 %vm3565_vm1, %v3566_v10 }
 0x84f   :  { %3243 = vmatprep.subr.bf16.mxu0 %v3564_v3 }
 0x852   :  { %3245 = vmatpush3.bf16.msra.mxu0 %v3640_v12 }
 0x853   :  { %3252 = vmatprep.subr.bf16.mxu0 %v3564_v3 }
 0x920   :  { %v613_v48 = vpop.f32.mrb[6].mxu0 }
 0x921   :  { %v618_v49 = vrot.slane %v613_v48, 4  ;;  %v3004_v50 = vpop.f32.mrb[7].mxu0 }
 0x923   :  { %v620_v51 = vadd.f32 %v618_v49, %v178_v20 }
 0x925   :  { %3380 = vtanh.f32 %v620_v51  ;;  %v2792_v53 = vmul.f32 -1.442695, %v620_v51 }
 0x927   :  { %3382 = vpow2.f32 %v2792_v53 }
 0x92f   :  { %v3381_v52 = vpop.eup %3380 }
 0x930   :  { %633 = vrot.lane.b32.xlu0 %v3381_v52, %s3568_s17 }
 0x931   :  { %v3383_v54 = vpop.eup %3382 }
 0x932   :  { %v624_v55 = vadd.f32 1.0, %v3383_v54 }
 0x934   :  { %3384 = vrcp.f32 %v624_v55 }
 0x93e   :  { %v3385_v56 = vpop.eup %3384 }
 0x93f   :  { %v631_v62 = vmul.f32 %v3385_v56, %v629_v61 }
 0x9a2   :  { %v634_v57 = vpop.permute.xlu0 %633 }
 0x9a3   :  { %v636_v58 = vmul.f32 %v3385_v56, %v634_v57 }
 0x9a5   :  { %638 = vrot.lane.b32.xlu1 %v636_v58, %s3569_s20 }
 0x9a9   :  { %51 = vperm.xlu1 %3354, %v49_v59  }
 0xa17   :  { %v639_v63 = vpop.permute.xlu1 %638 }
 0xa18   :  { %v641_v0 = vadd.f32 %v639_v63, %v631_v62 }
 0xa1a   :  { %3386 = vtanh.f32 %v641_v0  ;;  %v656_v1 = vrot.slane %v641_v0, 4 }
 0xa1c   :  { %657 = vrot.lane.b32.xlu1 %v656_v1, %s3570_s23 }
 0xa24   :  { %v3387_v2 = vpop.eup %3386 }
 0xa25   :  { %644 = vrot.lane.b32.xlu0 %v3387_v2, %s3568_s17 }
 0xa28   :  { %v3789_v9 = vpop.permute.xlu1 %51 }
 0xa29   :  { %vm53_vm11 = vcmp.eq.s32.totalorder %v3789_v9, 1 }
 0xa8e   :  { %v658_v18 = vpop.permute.xlu1 %657 }
 0xa97   :  { %v645_v4 = vpop.permute.xlu0 %644 }
 0xa98   :  { %v647_v5 = vmul.f32 %v3385_v56, %v645_v4 }
 0xa9a   :  { %v649_v8 = vrot.slane %v647_v5, 4 }
 0xa9c   :  { %650 = vrot.lane.b32.xlu0 %v649_v8, %s3569_s20 }
 0xaa0   :  { %660 = vrot.lane.b32.xlu0 %v535_v60, %s3570_s23 }
 0xb0e   :  { %v651_v11 = vpop.permute.xlu0 %650 }
 0xb0f   :  { %v654_v16 = vsel %vm53_vm11, %v651_v11, %v544_v47  ;;  %v664_v17 = vsel %vm53_vm11, %v651_v11, 0.0 }
 0xb10   :  { %665 = vst.msk [vmem:[#allocation2 + $0xc] sm:$0xf] %vm27_vm6, %v664_v17  ;;  %3014 = vmatmul.mubr.msk.f32.vlgmr.msra.gmra.mrb[4].mxu1 %vm191_vm2, %v654_v16 }
 0xb11   :  { %3248 = vmatpush3.bf16.msra.mxu1 %v3625_v7  ;;  %3035 = vmatprep.mubr.msk.f32.mxu1 %vm3565_vm1, %v3566_v10 }
 0xb12   :  { %v661_v19 = vpop.permute.xlu0 %660  ;;  %3249 = vmatprep.subr.bf16.mxu1 %v3564_v3 }
 0xb13   :  { %v663_v20 = vsel %vm53_vm11, %v658_v18, %v661_v19 }
 0xb14   :  { %748 = vrot.lane.b32.xlu0 %v663_v20, %s3569_s20 }
 0xb15   :  { %3251 = vmatpush3.bf16.msra.mxu1 %v3640_v12 }
 0xb18   :  { %57 = vperm.xlu0 %3355, %v55_v22  }
 0xb1c   :  { %768 = vrot.lane.b32.xlu0 %v654_v16, %s3570_s23 }
 0xb86   :  { %v749_v15 = vpop.permute.xlu0 %748 }
 0xb97   :  { %v3814_v43 = vpop.permute.xlu0 %57 }
 0xb98   :  { %vm59_vm13 = vcmp.eq.s32.totalorder %v3814_v43, 1 }
 0xb9b   :  { %v769_v48 = vpop.permute.xlu0 %768 }
 0xbe3   :  { %v735_v25 = vpop.f32.mrb[4].mxu1 }
 0xbe4   :  { %v739_v26 = vadd.f32 %v735_v25, %v183_v24  ;;  %v3015_v28 = vpop.f32.mrb[5].mxu1  ;;  %v67_v25 = vsel %vm66_vm0, 1, %v3567_v21 }
 0xbe6   :  { %3388 = vtanh.f32 %v739_v26  ;;  %v2794_v30 = vmul.f32 -1.442695, %v739_v26  ;;  %v299_v26 = vsel %vm35_vm4, %v3705_v42, 0.0 }
 0xbe8   :  { %3390 = vpow2.f32 %v2794_v30 }
 0xbf0   :  { %v3389_v29 = vpop.eup %3388 }
 0xbf1   :  { %753 = vrot.lane.b32.xlu1 %v3389_v29, %s3568_s17 }
 0xbf2   :  { %v3391_v31 = vpop.eup %3390 }
 0xbf3   :  { %v743_v32 = vadd.f32 1.0, %v3391_v31 }
 0xbf5   :  { %3392 = vrcp.f32 %v743_v32 }
 0xbff   :  { %v3393_v33 = vpop.eup %3392 }
 0xc00   :  { %v751_v36 = vmul.f32 %v3393_v33, %v749_v15 }
 0xc63   :  { %v754_v34 = vpop.permute.xlu1 %753 }
 0xc64   :  { %v756_v35 = vmul.f32 %v3393_v33, %v754_v34 }
 0xc66   :  { %758 = vrot.lane.b32.xlu1 %v756_v35, %s3569_s20 }
 0xcd8   :  { %v759_v45 = vpop.permute.xlu1 %758 }
 0xcd9   :  { %v761_v37 = vadd.f32 %v759_v45, %v751_v36 }
 0xcdb   :  { %3394 = vtanh.f32 %v761_v37  ;;  %v772_v61 = vsel %vm59_vm13, %v761_v37, %v749_v15 }
 0xcdc   :  { %v866_v62 = vrot.slane %v772_v61, 4 }
 0xce5   :  { %v3395_v40 = vpop.eup %3394 }
 0xce6   :  { %764 = vrot.lane.b32.xlu1 %v3395_v40, %s3568_s17 }
 0xd58   :  { %v765_v46 = vpop.permute.xlu1 %764 }
 0xd59   :  { %v3816_v47 = vmul.f32 %v3393_v33, %v765_v46  ;;  %v3867_v33 = vadd.f32 %v3712_v44, %v3667_v14 }
 0xd5b   :  { %v771_v49 = vsel %vm59_vm13, %v3816_v47, %v769_v48 }
 0xd5c   :  { %780 = vrot.lane.b32.xlu1 %v771_v49, %s3569_s20 }
 0xdce   :  { %v781_v50 = vpop.permute.xlu1 %780 }
 0xdcf   :  { %3025 = vmatmul.mubr.msk.f32.vlgmr.msra.gmra.mrb[8].mxu0 %vm191_vm2, %v781_v50 }
 0xdd0   :  { %3254 = vmatpush3.bf16.msra.mxu0 %v3625_v7  ;;  %3046 = vmatprep.mubr.msk.f32.mxu0 %vm3565_vm1, %v3566_v10 }
 0xdd1   :  { %3255 = vmatprep.subr.bf16.mxu0 %v3564_v3 }
 0xdd4   :  { %3257 = vmatpush3.bf16.msra.mxu0 %v3640_v12  ;;  %v61_v12 = vsel %vm60_vm14, 1, %v3567_v21 }
 0xdd5   :  { %3266 = vmatprep.subr.bf16.mxu0 %v3564_v3 }
 0xea2   :  { %v850_v51 = vpop.f32.mrb[8].mxu0 }
 0xea3   :  { %v855_v52 = vrot.slane %v850_v51, 4  ;;  %v3026_v53 = vpop.f32.mrb[9].mxu0  ;;  %v1142_v51 = vld [vmem:[%s4332_s2 + $0x38] sm:$0xff] }
 0xea5   :  { %v857_v54 = vadd.f32 %v855_v52, %v183_v24  ;;  %v1143_v52 = vld [vmem:[%s4332_s2 + $0x40] sm:$0xff] }
 0xea6   :  { %v3258_v53 = vpack.c.bf16 %v1143_v52, %v1142_v51 }
 0xea7   :  { %3396 = vtanh.f32 %v857_v54  ;;  %v2796_v56 = vmul.f32 -1.442695, %v857_v54  ;;  %v1144_v54 = vld [vmem:[%s4332_s2 + $0x48] sm:$0xff] }
 0xea8   :  { %3259 = vmatprep.subr.bf16.mxu1 %v3258_v53 }
 0xea9   :  { %3398 = vpow2.f32 %v2796_v56 }
 0xeb1   :  { %v3397_v55 = vpop.eup %3396 }
 0xeb2   :  { %870 = vrot.lane.b32.xlu0 %v3397_v55, %s3568_s17  ;;  %v1145_v55 = vld [vmem:[%s4332_s2 + $0x50] sm:$0xff] }
 0xeb3   :  { %v3399_v7 = vpop.eup %3398  ;;  %v3262_v56 = vpack.c.bf16 %v1145_v55, %v1144_v54 }
 0xeb4   :  { %v861_v57 = vadd.f32 1.0, %v3399_v7 }
 0xeb6   :  { %3400 = vrcp.f32 %v861_v57 }
 0xec0   :  { %v3401_v58 = vpop.eup %3400 }
 0xec1   :  { %v868_v63 = vmul.f32 %v3401_v58, %v866_v62  ;;  %v1148_v62 = vld [vmem:[%s4332_s2 + $0x68] sm:$0xff] }
 0xf24   :  { %v871_v59 = vpop.permute.xlu0 %870 }
 0xf25   :  { %v873_v60 = vmul.f32 %v3401_v58, %v871_v59  ;;  %v536_v59 = vsel %vm47_vm9, %v3765_v41, 0.0  ;;  %v1149_v41 = vld [vmem:[%s4332_s2 + $0x70] sm:$0xff] }
 0xf27   :  { %875 = vrot.lane.b32.xlu1 %v873_v60, %s3569_s20  ;;  %v1146_v60 = vld [vmem:[%s4332_s2 + $0x58] sm:$0xff] }
 0xf2b   :  { %63 = vperm.xlu1 %3354, %v61_v12   ;;  %v1147_v12 = vld [vmem:[%s4332_s2 + $0x60] sm:$0xff] }
 0xf99   :  { %v876_v0 = vpop.permute.xlu1 %875 }
 0xf9a   :  { %v878_v1 = vadd.f32 %v876_v0, %v868_v63  ;;  %v3920_v0 = vpack.c.bf16 %v1149_v41, %v1148_v62 }
 0xf9c   :  { %3402 = vtanh.f32 %v878_v1  ;;  %v893_v2 = vrot.slane %v878_v1, 4 }
 0xf9e   :  { %894 = vrot.lane.b32.xlu1 %v893_v2, %s3570_s23  ;;  %v1256_v2 = vrot.slane %v3649_v13, 4  ;;  %v73_v13 = vsel %vm72_vm5, 1, %v3567_v21 }
 0xfa6   :  { %v3403_v4 = vpop.eup %3402 }
 0xfa7   :  { %881 = vrot.lane.b32.xlu0 %v3403_v4, %s3568_s17 }
 0xfaa   :  { %v3840_v16 = vpop.permute.xlu1 %63 }
 0xfab   :  { %vm65_vm15 = vcmp.eq.s32.totalorder %v3840_v16, 1 }
0x1010   :  { %v895_v20 = vpop.permute.xlu1 %894 }
0x1019   :  { %v882_v5 = vpop.permute.xlu0 %881 }
0x101a   :  { %v884_v8 = vmul.f32 %v3401_v58, %v882_v5 }
0x101c   :  { %v886_v11 = vrot.slane %v884_v8, 4 }
0x101e   :  { %887 = vrot.lane.b32.xlu0 %v886_v11, %s3569_s20 }
0x1022   :  { %897 = vrot.lane.b32.xlu0 %v772_v61, %s3570_s23  ;;  %v3907_v61 = vpack.c.bf16 %v1147_v12, %v1146_v60 }
0x1090   :  { %v888_v17 = vpop.permute.xlu0 %887 }
0x1091   :  { %v891_v18 = vsel %vm65_vm15, %v888_v17, %v781_v50  ;;  %v901_v19 = vsel %vm65_vm15, %v888_v17, 0.0 }
0x1092   :  { %902 = vst.msk [vmem:[#allocation2 + $0x14] sm:$0xf] %vm27_vm6, %v901_v19  ;;  %3036 = vmatmul.mubr.msk.f32.vlgmr.msra.gmra.mrb[6].mxu1 %vm191_vm2, %v891_v18 }
0x1093   :  { %3261 = vmatpush3.bf16.msra.mxu1 %v3258_v53 }
0x1094   :  { %v898_v22 = vpop.permute.xlu0 %897  ;;  %3263 = vmatprep.subr.bf16.mxu1 %v3262_v56 }
0x1095   :  { %v900_v24 = vsel %vm65_vm15, %v895_v20, %v898_v22  ;;  %v3947_v20 = vld [vmem:[%s4332_s2 + $0x78] ss:$0 sm:$0xff] }
0x1096   :  { %985 = vrot.lane.b32.xlu0 %v900_v24, %s3569_s20 }
0x1097   :  { %3265 = vmatpush3.bf16.msra.mxu1 %v3262_v56 }
0x1098   :  { %3272 = vmatprep.subr.bf16.mxu1 %v3564_v3 }
0x109a   :  { %69 = vperm.xlu0 %3355, %v67_v25  }
0x109e   :  { %1005 = vrot.lane.b32.xlu0 %v891_v18, %s3570_s23 }
0x10a2   :  { %301 = vrot.lane.b32.xlu0 %v299_v26, %s3569_s20 }
0x1108   :  { %v3859_v28 = vpop.permute.xlu0 %985 }
0x1119   :  { %v3861_v29 = vpop.permute.xlu0 %69 }
0x111a   :  { %vm71_vm3 = vcmp.eq.s32.totalorder %v3861_v29, 1 }
0x111d   :  { %v1006_v30 = vpop.permute.xlu0 %1005 }
0x1121   :  { %v302_v31 = vpop.permute.xlu0 %301 }
0x1122   :  { %304 = vst.msk [vmem:[#allocation2] sm:$0xf] %vm27_vm6, %v302_v31 }
0x1129   :  { %v1151_v32 = vld [vmem:[#allocation2] sm:$0xff] }
0x112a   :  { %3057 = vmatprep.mubr.msk.f32.mxu1 %vm191_vm2, %v1151_v32  ;;  %v1337_v32 = vrot.slane %v3678_v23, 4 }
0x1165   :  { %v972_v34 = vpop.f32.mrb[6].mxu1 }
0x1166   :  { %v976_v42 = vadd.f32 %v972_v34, %v3867_v33  ;;  %v3037_v35 = vpop.f32.mrb[7].mxu1 }
0x1168   :  { %3404 = vtanh.f32 %v976_v42  ;;  %v2798_v36 = vmul.f32 -1.442695, %v976_v42 }
0x116a   :  { %3406 = vpow2.f32 %v2798_v36 }
0x1172   :  { %v3405_v15 = vpop.eup %3404 }
0x1173   :  { %990 = vrot.lane.b32.xlu1 %v3405_v15, %s3568_s17 }
0x1174   :  { %v3407_v45 = vpop.eup %3406 }
0x1175   :  { %v980_v37 = vadd.f32 1.0, %v3407_v45 }
0x1177   :  { %3408 = vrcp.f32 %v980_v37 }
0x1181   :  { %v3409_v40 = vpop.eup %3408 }
0x1182   :  { %v988_v14 = vmul.f32 %v3409_v40, %v3859_v28 }
0x11e5   :  { %v991_v46 = vpop.permute.xlu1 %990 }
0x11e6   :  { %v993_v48 = vmul.f32 %v3409_v40, %v991_v46 }
0x11e8   :  { %995 = vrot.lane.b32.xlu1 %v993_v48, %s3569_s20 }
0x125a   :  { %v996_v44 = vpop.permute.xlu1 %995 }
0x125b   :  { %v3873_v49 = vadd.f32 %v996_v44, %v988_v14 }
0x125d   :  { %3410 = vtanh.f32 %v3873_v49  ;;  %v3965_v14 = vsel %vm71_vm3, %v3873_v49, %v3859_v28  ;;  %v773_v28 = vsel %vm59_vm13, %v3816_v47, 0.0 }
0x125e   :  { %v1103_v44 = vrot.slane %v3965_v14, 4 }
0x1267   :  { %v3411_v50 = vpop.eup %3410 }
0x1268   :  { %1001 = vrot.lane.b32.xlu1 %v3411_v50, %s3568_s17 }
0x12da   :  { %v1002_v7 = vpop.permute.xlu1 %1001 }
0x12db   :  { %v3889_v57 = vmul.f32 %v3409_v40, %v1002_v7 }
0x12dd   :  { %v1008_v58 = vsel %vm71_vm3, %v3889_v57, %v1006_v30  ;;  %v1010_v49 = vsel %vm71_vm3, %v3889_v57, 0.0 }
0x12de   :  { %1017 = vrot.lane.b32.xlu1 %v1008_v58, %s3569_s20 }
0x12e2   :  { %538 = vrot.lane.b32.xlu1 %v536_v59, %s3569_s20 }
0x1350   :  { %v3915_v63 = vpop.permute.xlu1 %1017 }
0x1351   :  { %3047 = vmatmul.mubr.msk.f32.vlgmr.msra.gmra.mrb[10].mxu0 %vm191_vm2, %v3915_v63 }
0x1352   :  { %3268 = vmatpush3.bf16.msra.mxu0 %v3907_v61  ;;  %3071 = vmatprep.mubr.msk.f32.mxu0 %vm3565_vm1, %v3566_v10 }
0x1353   :  { %3269 = vmatprep.subr.bf16.mxu0 %v3564_v3 }
0x1354   :  { %v539_v1 = vpop.permute.xlu1 %538 }
0x1355   :  { %541 = vst.msk [vmem:[#allocation2 + $0x8] sm:$0xf] %vm27_vm6, %v539_v1 }
0x1356   :  { %3271 = vmatpush3.bf16.msra.mxu0 %v3920_v0 }
0x1357   :  { %3278 = vmatprep.subr.bf16.mxu0 %v3564_v3 }
0x1359   :  { %3072 = vmatmul.mubr.msk.f32.vlgmr.msra.gmra.mrb[12].mxu0 %vm191_vm2, %v1256_v2 }
0x135a   :  { %3280 = vmatpush3.bf16.msra.mxu0 %v3907_v61  ;;  %3093 = vmatprep.mubr.msk.f32.mxu0 %vm3565_vm1, %v3566_v10 }
0x135b   :  { %3281 = vmatprep.subr.bf16.mxu0 %v3564_v3 }
0x135c   :  { %v1152_v4 = vld [vmem:[#allocation2 + $0x8] sm:$0xff] }
0x135d   :  { %3058 = vmatmul.mubr.msk.f32.vlgmr.msra.gmra.mrb[8].mxu1 %vm191_vm2, %v1152_v4 }
0x135e   :  { %3274 = vmatpush3.bf16.msra.mxu1 %v3907_v61  ;;  %3283 = vmatpush3.bf16.msra.mxu0 %v3920_v0 }
0x135f   :  { %3275 = vmatprep.subr.bf16.mxu1 %v3564_v3  ;;  %3290 = vmatprep.subr.bf16.mxu0 %v3564_v3 }
0x1362   :  { %3277 = vmatpush3.bf16.msra.mxu1 %v3920_v0 }
0x1363   :  { %3284 = vmatprep.subr.bf16.mxu1 %v3564_v3 }
0x1424   :  { %v1087_v5 = vpop.f32.mrb[10].mxu0 }
0x1425   :  { %v1092_v8 = vrot.slane %v1087_v5, 4  ;;  %v3048_v11 = vpop.f32.mrb[11].mxu0 }
0x1427   :  { %v1094_v17 = vadd.f32 %v1092_v8, %v3867_v33 }
0x1429   :  { %3412 = vtanh.f32 %v1094_v17  ;;  %v2800_v33 = vmul.f32 -1.442695, %v1094_v17 }
0x142c   :  { %v1325_v18 = vpop.f32.mrb[12].mxu0 }
0x142d   :  { %v3073_v19 = vpop.f32.mrb[13].mxu0 }
0x1430   :  { %v3949_v22 = vpop.f32.mrb[8].mxu1 }
0x1431   :  { %v1237_v24 = vpop.f32.mrb[9].mxu1 }
0x1432   :  { %v3952_v25 = vadd.f32 %v3947_v20, %v1237_v24 }
0x1433   :  { %v3413_v26 = vpop.eup %3412 }
0x1434   :  { %v1329_v30 = vadd.f32 %v1325_v18, %v3952_v25  ;;  %1107 = vrot.lane.b32.xlu0 %v3413_v26, %s3568_s17 }
0x1436   :  { %3414 = vtanh.f32 %v1329_v30  ;;  %v2807_v34 = vmul.f32 -1.442695, %v1329_v30 }
0x1437   :  { %3416 = vpow2.f32 %v2800_v33 }
0x1438   :  { %3418 = vpow2.f32 %v2807_v34 }
0x1440   :  { %v3415_v31 = vpop.eup %3414 }
0x1441   :  { %1343 = vrot.lane.b32.xlu1 %v3415_v31, %s3568_s17  ;;  %v3417_v42 = vpop.eup %3416 }
0x1442   :  { %v1098_v35 = vadd.f32 1.0, %v3417_v42  ;;  %v3419_v15 = vpop.eup %3418 }
0x1443   :  { %v1333_v36 = vadd.f32 1.0, %v3419_v15 }
0x1444   :  { %3420 = vrcp.f32 %v1098_v35 }
0x1445   :  { %1338 = vrot.lane.b32.xlu1 %v1337_v32, %s3569_s20  ;;  %3422 = vrcp.f32 %v1333_v36 }
0x144e   :  { %v3421_v45 = vpop.eup %3420 }
0x144f   :  { %v3423_v46 = vpop.eup %3422  ;;  %v1105_v50 = vmul.f32 %v3421_v45, %v1103_v44 }
0x14a6   :  { %v1108_v37 = vpop.permute.xlu0 %1107 }
0x14a7   :  { %v1110_v40 = vmul.f32 %v3421_v45, %v1108_v37 }
0x14a9   :  { %1112 = vrot.lane.b32.xlu0 %v1110_v40, %s3569_s20 }
0x14b3   :  { %v1344_v48 = vpop.permute.xlu1 %1343 }
0x14b4   :  { %v1346_v23 = vmul.f32 %v3423_v46, %v1344_v48 }
0x14b6   :  { %1348 = vrot.lane.b32.xlu0 %v1346_v23, %s3569_s20 }
0x14b7   :  { %v3971_v53 = vpop.permute.xlu1 %1338 }
0x14b8   :  { %v1341_v54 = vmul.f32 %v3423_v46, %v3971_v53 }
0x151b   :  { %v1113_v51 = vpop.permute.xlu0 %1112 }
0x151c   :  { %v3968_v52 = vadd.f32 %v1113_v51, %v1105_v50 }
0x151e   :  { %3424 = vtanh.f32 %v3968_v52 }
0x1528   :  { %v3425_v55 = vpop.eup %3424  ;;  %v1349_v56 = vpop.permute.xlu0 %1348 }
0x1529   :  { %v3974_v7 = vadd.f32 %v1349_v56, %v1341_v54  ;;  %1118 = vrot.lane.b32.xlu1 %v3425_v55, %s3568_s17 }
0x152b   :  { %3426 = vtanh.f32 %v3974_v7  ;;  %v1362_v36 = vsel %vm35_vm4, %v3974_v7, %v3971_v53 }
0x152d   :  { %1358 = vrot.lane.b32.xlu1 %v1256_v2, %s3570_s23 }
0x1531   :  { %775 = vrot.lane.b32.xlu1 %v773_v28, %s3569_s20  ;;  %v1243_v28 = vadd.f32 %v3949_v22, %v3947_v20 }
0x1535   :  { %v3427_v58 = vpop.eup %3426  ;;  %1012 = vrot.lane.b32.xlu1 %v1010_v49, %s3569_s20 }
0x1536   :  { %1354 = vrot.lane.b32.xlu0 %v3427_v58, %s3568_s17 }
0x153a   :  { %75 = vperm.xlu0 %3355, %v73_v13  }
0x159b   :  { %v1119_v59 = vpop.permute.xlu1 %1118 }
0x159c   :  { %v1121_v60 = vmul.f32 %v3421_v45, %v1119_v59 }
0x159e   :  { %v1123_v12 = vrot.slane %v1121_v60, 4 }
0x159f   :  { %v1359_v47 = vpop.permute.xlu1 %1358 }
0x15a0   :  { %1124 = vrot.lane.b32.xlu0 %v1123_v12, %s3569_s20 }
0x15a3   :  { %v776_v62 = vpop.permute.xlu1 %775 }
0x15a4   :  { %778 = vst.msk [vmem:[#allocation2 + $0x10] sm:$0xf] %vm27_vm6, %v776_v62 }
0x15a7   :  { %v1013_v57 = vpop.permute.xlu1 %1012 }
0x15a8   :  { %1015 = vst.msk [vmem:[#allocation2 + $0x18] sm:$0xf] %vm27_vm6, %v1013_v57  ;;  %v1355_v27 = vpop.permute.xlu0 %1354 }
0x15a9   :  { %v3995_v41 = vmul.f32 %v3423_v46, %v1355_v27 }
0x15ab   :  { %v1153_v1 = vld [vmem:[#allocation2 + $0x10] sm:$0xff]  ;;  %v1361_v21 = vsel %vm35_vm4, %v3995_v41, %v1359_v47 }
0x15ac   :  { %3060 = vmatprep.mubr.msk.f32.mxu1 %vm191_vm2, %v1153_v1  ;;  %1370 = vrot.lane.b32.xlu0 %v1361_v21, %s3569_s20 }
0x15b9   :  { %v4002_v2 = vpop.permute.xlu0 %75 }
0x15ba   :  { %vm77_vm8 = vcmp.eq.s32.totalorder %v4002_v2, 1 }
0x1612   :  { %v1125_v4 = vpop.permute.xlu0 %1124 }
0x1613   :  { %v1128_v5 = vsel %vm77_vm8, %v1125_v4, %v3915_v63  ;;  %v1138_v8 = vsel %vm77_vm8, %v1125_v4, 0.0 }
0x1614   :  { %1139 = vst.msk [vmem:[#allocation2 + $0x1c] sm:$0xf] %vm27_vm6, %v1138_v8  ;;  %1140 = vst.msk [vmem:[%s4336_s6] sm:$0xf] %vm27_vm6, %v1128_v5 }
0x161b   :  { %v1154_v11 = vld [vmem:[#allocation2 + $0x18] sm:$0xff] }
0x161c   :  { %3061 = vmatmul.mubr.msk.f32.gmra.mrb[10].mxu1 %vm191_vm2, %v1154_v11 }
0x161d   :  { %3082 = vmatprep.mubr.msk.f32.mxu1 %vm3565_vm1, %v3566_v10 }
0x161e   :  { %v1371_v17 = vpop.permute.xlu0 %1370 }
0x1620   :  { %3083 = vmatmul.mubr.msk.f32.vlgmr.msra.gmra.mrb[12].mxu1 %vm191_vm2, %v1371_v17 }
0x1621   :  { %3286 = vmatpush3.bf16.msra.mxu1 %v3907_v61  ;;  %3104 = vmatprep.mubr.msk.f32.mxu1 %vm3565_vm1, %v3566_v10 }
0x1622   :  { %3287 = vmatprep.subr.bf16.mxu1 %v3564_v3 }
0x1625   :  { %3289 = vmatpush3.bf16.msra.mxu1 %v3920_v0 }
0x1626   :  { %3296 = vmatprep.subr.bf16.mxu1 %v3564_v3 }
0x16ef   :  { %v4025_v63 = vpop.f32.mrb[10].mxu1 }
0x16f0   :  { %v4027_v18 = vpop.f32.mrb[11].mxu1 }
0x16f3   :  { %v1440_v19 = vpop.f32.mrb[12].mxu1 }
0x16f4   :  { %v1445_v24 = vrot.slane %v1440_v19, 4  ;;  %v3084_v26 = vpop.f32.mrb[13].mxu1 }
0x16f6   :  { %v1447_v30 = vadd.f32 %v1445_v24, %v3952_v25  ;;  %v1456_v25 = vrot.slane %v1362_v36, 4 }
0x16f8   :  { %3428 = vtanh.f32 %v1447_v30  ;;  %v2809_v32 = vmul.f32 -1.442695, %v1447_v30 }
0x16fa   :  { %3430 = vpow2.f32 %v2809_v32 }
0x1702   :  { %v3429_v31 = vpop.eup %3428 }
0x1703   :  { %1460 = vrot.lane.b32.xlu1 %v3429_v31, %s3568_s17 }
0x1704   :  { %v3431_v33 = vpop.eup %3430 }
0x1705   :  { %v1451_v34 = vadd.f32 1.0, %v3431_v33 }
0x1707   :  { %3432 = vrcp.f32 %v1451_v34 }
0x1711   :  { %v3433_v42 = vpop.eup %3432 }
0x1712   :  { %v1458_v45 = vmul.f32 %v3433_v42, %v1456_v25 }
0x1775   :  { %v1461_v35 = vpop.permute.xlu1 %1460 }
0x1776   :  { %v1463_v15 = vmul.f32 %v3433_v42, %v1461_v35 }
0x1778   :  { %1465 = vrot.lane.b32.xlu0 %v1463_v15, %s3569_s20 }
0x17ea   :  { %v1466_v37 = vpop.permute.xlu0 %1465 }
0x17eb   :  { %v1468_v40 = vadd.f32 %v1466_v37, %v1458_v45 }
0x17ed   :  { %3434 = vtanh.f32 %v1468_v40  ;;  %v1483_v48 = vrot.slane %v1468_v40, 4 }
0x17f7   :  { %v3435_v46 = vpop.eup %3434 }
0x17f8   :  { %1471 = vrot.lane.b32.xlu1 %v3435_v46, %s3568_s17 }
0x17fc   :  { %1484 = vrot.lane.b32.xlu1 %v1483_v48, %s3570_s23 }
0x186a   :  { %v1472_v23 = vpop.permute.xlu1 %1471 }
0x186b   :  { %v1474_v44 = vmul.f32 %v3433_v42, %v1472_v23 }
0x186d   :  { %v1476_v50 = vrot.slane %v1474_v44, 4 }
0x186e   :  { %v1485_v55 = vpop.permute.xlu1 %1484 }
0x186f   :  { %1477 = vrot.lane.b32.xlu0 %v1476_v50, %s3569_s20 }
0x1873   :  { %1487 = vrot.lane.b32.xlu0 %v1362_v36, %s3570_s23 }
0x18e1   :  { %v1478_v51 = vpop.permute.xlu0 %1477 }
0x18e2   :  { %v1481_v53 = vsel %vm41_vm7, %v1478_v51, %v1371_v17  ;;  %v1491_v54 = vsel %vm41_vm7, %v1478_v51, 0.0 }
0x18e3   :  { %1493 = vst.msk [vmem:[#allocation3 + $0x4] sm:$0xf] %vm27_vm6, %v1491_v54  ;;  %3094 = vmatmul.mubr.msk.f32.vlgmr.msra.gmra.mrb[14].mxu0 %vm191_vm2, %v1481_v53 }
0x18e4   :  { %3292 = vmatpush3.bf16.msra.mxu0 %v3907_v61  ;;  %3115 = vmatprep.mubr.msk.f32.mxu0 %vm3565_vm1, %v3566_v10 }
0x18e5   :  { %v1488_v56 = vpop.permute.xlu0 %1487  ;;  %3293 = vmatprep.subr.bf16.mxu0 %v3564_v3 }
0x18e6   :  { %v1490_v7 = vsel %vm41_vm7, %v1485_v55, %v1488_v56  ;;  %vm2405_vm7 = vcmask 253952  }
0x18e7   :  { %1576 = vrot.lane.b32.xlu0 %v1490_v7, %s3569_s20 }
0x18e8   :  { %3295 = vmatpush3.bf16.msra.mxu0 %v3920_v0 }
0x18e9   :  { %3302 = vmatprep.subr.bf16.mxu0 %v3564_v3 }
0x1959   :  { %v1577_v22 = vpop.permute.xlu0 %1576 }
0x19b6   :  { %v1563_v49 = vpop.f32.mrb[14].mxu0 }
0x19b7   :  { %v1567_v58 = vadd.f32 %v1563_v49, %v1243_v28  ;;  %v3095_v13 = vpop.f32.mrb[15].mxu0  ;;  %v1248_v49 = vadd.f32 %v3947_v20, %v4027_v18 }
0x19b9   :  { %3436 = vtanh.f32 %v1567_v58  ;;  %v2811_v60 = vmul.f32 -1.442695, %v1567_v58 }
0x19bb   :  { %3438 = vpow2.f32 %v2811_v60 }
0x19c3   :  { %v3437_v59 = vpop.eup %3436 }
0x19c4   :  { %1581 = vrot.lane.b32.xlu1 %v3437_v59, %s3568_s17 }
0x19c5   :  { %v3439_v6 = vpop.eup %3438 }
0x19c6   :  { %v1571_v12 = vadd.f32 1.0, %v3439_v6 }
0x19c8   :  { %3440 = vrcp.f32 %v1571_v12 }
0x19d2   :  { %v3441_v47 = vpop.eup %3440 }
0x19d3   :  { %v1579_v27 = vmul.f32 %v3441_v47, %v1577_v22 }
0x1a36   :  { %v1582_v62 = vpop.permute.xlu1 %1581 }
0x1a37   :  { %v1584_v57 = vmul.f32 %v3441_v47, %v1582_v62 }
0x1a39   :  { %1586 = vrot.lane.b32.xlu1 %v1584_v57, %s3569_s20 }
0x1a3d   :  { %1596 = vrot.lane.b32.xlu1 %v1481_v53, %s3570_s23 }
0x1aab   :  { %v1587_v1 = vpop.permute.xlu1 %1586 }
0x1aac   :  { %v1589_v21 = vadd.f32 %v1587_v1, %v1579_v27 }
0x1aae   :  { %3442 = vtanh.f32 %v1589_v21  ;;  %v1600_v25 = vsel %vm47_vm9, %v1589_v21, %v1577_v22 }
0x1aaf   :  { %v1597_v11 = vpop.permute.xlu1 %1596  ;;  %v1695_v45 = vrot.slane %v1600_v25, 4 }
0x1ab8   :  { %v3443_v4 = vpop.eup %3442 }
0x1ab9   :  { %1592 = vrot.lane.b32.xlu0 %v3443_v4, %s3568_s17 }
0x1b2b   :  { %v1593_v5 = vpop.permute.xlu0 %1592 }
0x1b2c   :  { %v4061_v8 = vmul.f32 %v3441_v47, %v1593_v5 }
0x1b2e   :  { %v1599_v17 = vsel %vm47_vm9, %v4061_v8, %v1597_v11 }
0x1b2f   :  { %1609 = vrot.lane.b32.xlu0 %v1599_v17, %s3569_s20 }
0x1ba1   :  { %v1610_v19 = vpop.permute.xlu0 %1609 }
0x1ba2   :  { %3105 = vmatmul.mubr.msk.f32.vlgmr.msra.gmra.mrb[14].mxu1 %vm191_vm2, %v1610_v19 }
0x1ba3   :  { %3298 = vmatpush3.bf16.msra.mxu1 %v3907_v61  ;;  %3126 = vmatprep.mubr.msk.f32.mxu1 %vm3565_vm1, %v3566_v10 }
0x1ba4   :  { %3299 = vmatprep.subr.bf16.mxu1 %v3564_v3 }
0x1ba7   :  { %3301 = vmatpush3.bf16.msra.mxu1 %v3920_v0 }
0x1ba8   :  { %3308 = vmatprep.subr.bf16.mxu1 %v3564_v3 }
0x1c75   :  { %v1679_v24 = vpop.f32.mrb[14].mxu1 }
0x1c76   :  { %v1684_v26 = vrot.slane %v1679_v24, 4  ;;  %v3106_v30 = vpop.f32.mrb[15].mxu1 }
0x1c78   :  { %v1686_v31 = vadd.f32 %v1684_v26, %v1243_v28 }
0x1c7a   :  { %3444 = vtanh.f32 %v1686_v31  ;;  %v2813_v33 = vmul.f32 -1.442695, %v1686_v31 }
0x1c7c   :  { %3446 = vpow2.f32 %v2813_v33 }
0x1c84   :  { %v3445_v32 = vpop.eup %3444 }
0x1c85   :  { %1699 = vrot.lane.b32.xlu1 %v3445_v32, %s3568_s17 }
0x1c86   :  { %v3447_v34 = vpop.eup %3446 }
0x1c87   :  { %v1690_v42 = vadd.f32 1.0, %v3447_v34 }
0x1c89   :  { %3448 = vrcp.f32 %v1690_v42 }
0x1c93   :  { %v3449_v35 = vpop.eup %3448 }
0x1c94   :  { %v1697_v37 = vmul.f32 %v3449_v35, %v1695_v45 }
0x1cf7   :  { %v1700_v15 = vpop.permute.xlu1 %1699 }
0x1cf8   :  { %v1702_v36 = vmul.f32 %v3449_v35, %v1700_v15 }
0x1cfa   :  { %1704 = vrot.lane.b32.xlu0 %v1702_v36, %s3569_s20 }
0x1d6c   :  { %v1705_v40 = vpop.permute.xlu0 %1704 }
0x1d6d   :  { %v1707_v46 = vadd.f32 %v1705_v40, %v1697_v37 }
0x1d6f   :  { %3450 = vtanh.f32 %v1707_v46  ;;  %v1722_v23 = vrot.slane %v1707_v46, 4 }
0x1d79   :  { %v3451_v48 = vpop.eup %3450 }
0x1d7a   :  { %1710 = vrot.lane.b32.xlu1 %v3451_v48, %s3568_s17 }
0x1d7e   :  { %1723 = vrot.lane.b32.xlu1 %v1722_v23, %s3570_s23 }
0x1dec   :  { %v1711_v44 = vpop.permute.xlu1 %1710 }
0x1ded   :  { %v1713_v50 = vmul.f32 %v3449_v35, %v1711_v44 }
0x1def   :  { %v1715_v51 = vrot.slane %v1713_v50, 4 }
0x1df0   :  { %v1724_v56 = vpop.permute.xlu1 %1723 }
0x1df1   :  { %1716 = vrot.lane.b32.xlu0 %v1715_v51, %s3569_s20 }
0x1df5   :  { %1726 = vrot.lane.b32.xlu0 %v1600_v25, %s3570_s23 }
0x1e63   :  { %v1717_v53 = vpop.permute.xlu0 %1716 }
0x1e64   :  { %v1720_v54 = vsel %vm53_vm11, %v1717_v53, %v1610_v19  ;;  %v1730_v55 = vsel %vm53_vm11, %v1717_v53, 0.0 }
0x1e65   :  { %1732 = vst.msk [vmem:[#allocation3 + $0xc] sm:$0xf] %vm27_vm6, %v1730_v55  ;;  %3116 = vmatmul.mubr.msk.f32.vlgmr.msra.gmra.mrb[16].mxu0 %vm191_vm2, %v1720_v54 }
0x1e66   :  { %3304 = vmatpush3.bf16.msra.mxu0 %v3907_v61  ;;  %3137 = vmatprep.mubr.msk.f32.mxu0 %vm3565_vm1, %v3566_v10 }
0x1e67   :  { %v1727_v7 = vpop.permute.xlu0 %1726  ;;  %3305 = vmatprep.subr.bf16.mxu0 %v3564_v3 }
0x1e68   :  { %v1729_v28 = vsel %vm53_vm11, %v1724_v56, %v1727_v7  ;;  %v1253_v7 = vadd.f32 %v4025_v63, %v3947_v20 }
0x1e69   :  { %1815 = vrot.lane.b32.xlu0 %v1729_v28, %s3569_s20 }
0x1e6a   :  { %3307 = vmatpush3.bf16.msra.mxu0 %v3920_v0 }
0x1e6b   :  { %3314 = vmatprep.subr.bf16.mxu0 %v3564_v3 }
0x1edb   :  { %v1816_v18 = vpop.permute.xlu0 %1815 }
0x1f38   :  { %v1802_v58 = vpop.f32.mrb[16].mxu0 }
0x1f39   :  { %v1806_v13 = vadd.f32 %v1802_v58, %v1248_v49  ;;  %v3117_v59 = vpop.f32.mrb[17].mxu0 }
0x1f3b   :  { %3452 = vtanh.f32 %v1806_v13  ;;  %v2815_v6 = vmul.f32 -1.442695, %v1806_v13 }
0x1f3d   :  { %3454 = vpow2.f32 %v2815_v6 }
0x1f45   :  { %v3453_v60 = vpop.eup %3452 }
0x1f46   :  { %1820 = vrot.lane.b32.xlu1 %v3453_v60, %s3568_s17 }
0x1f47   :  { %v3455_v9 = vpop.eup %3454 }
0x1f48   :  { %v1810_v12 = vadd.f32 1.0, %v3455_v9 }
0x1f4a   :  { %3456 = vrcp.f32 %v1810_v12 }
0x1f54   :  { %v3457_v47 = vpop.eup %3456 }
0x1f55   :  { %v1818_v22 = vmul.f32 %v3457_v47, %v1816_v18 }
0x1fb8   :  { %v1821_v62 = vpop.permute.xlu1 %1820 }
0x1fb9   :  { %v1823_v57 = vmul.f32 %v3457_v47, %v1821_v62 }
0x1fbb   :  { %1825 = vrot.lane.b32.xlu1 %v1823_v57, %s3569_s20 }
0x1fbf   :  { %1835 = vrot.lane.b32.xlu1 %v1720_v54, %s3570_s23 }
0x202d   :  { %v1826_v27 = vpop.permute.xlu1 %1825 }
0x202e   :  { %v1828_v1 = vadd.f32 %v1826_v27, %v1818_v22 }
0x2030   :  { %3458 = vtanh.f32 %v1828_v1 }
0x2031   :  { %v1836_v11 = vpop.permute.xlu1 %1835 }
0x203a   :  { %v3459_v21 = vpop.eup %3458 }
0x203b   :  { %1831 = vrot.lane.b32.xlu0 %v3459_v21, %s3568_s17 }
0x20ad   :  { %v1832_v4 = vpop.permute.xlu0 %1831 }
0x20ae   :  { %v4103_v5 = vmul.f32 %v3457_v47, %v1832_v4 }
0x20b0   :  { %v1838_v17 = vsel %vm59_vm13, %v4103_v5, %v1836_v11 }
0x20b1   :  { %1848 = vrot.lane.b32.xlu0 %v1838_v17, %s3569_s20 }
0x2123   :  { %v1849_v19 = vpop.permute.xlu0 %1848 }
0x2124   :  { %3127 = vmatmul.mubr.msk.f32.vlgmr.msra.gmra.mrb[16].mxu1 %vm191_vm2, %v1849_v19 }
0x2125   :  { %3310 = vmatpush3.bf16.msra.mxu1 %v3907_v61  ;;  %3148 = vmatprep.mubr.msk.f32.mxu1 %vm3565_vm1, %v3566_v10 }
0x2126   :  { %3311 = vmatprep.subr.bf16.mxu1 %v3564_v3 }
0x2129   :  { %3313 = vmatpush3.bf16.msra.mxu1 %v3920_v0  ;;  %v1839_v0 = vsel %vm59_vm13, %v1828_v1, %v1816_v18 }
0x212a   :  { %3320 = vmatprep.subr.bf16.mxu1 %v3564_v3  ;;  %v1934_v36 = vrot.slane %v1839_v0, 4 }
0x21f7   :  { %v1918_v24 = vpop.f32.mrb[16].mxu1 }
0x21f8   :  { %v1923_v26 = vrot.slane %v1918_v24, 4  ;;  %v3128_v30 = vpop.f32.mrb[17].mxu1 }
0x21fa   :  { %v1925_v31 = vadd.f32 %v1923_v26, %v1248_v49 }
0x21fc   :  { %3460 = vtanh.f32 %v1925_v31  ;;  %v2817_v33 = vmul.f32 -1.442695, %v1925_v31 }
0x21fe   :  { %3462 = vpow2.f32 %v2817_v33 }
0x2206   :  { %v3461_v32 = vpop.eup %3460 }
0x2207   :  { %1938 = vrot.lane.b32.xlu1 %v3461_v32, %s3568_s17 }
0x2208   :  { %v3463_v61 = vpop.eup %3462 }
0x2209   :  { %v1929_v34 = vadd.f32 1.0, %v3463_v61 }
0x220b   :  { %3464 = vrcp.f32 %v1929_v34 }
0x2215   :  { %v3465_v42 = vpop.eup %3464 }
0x2216   :  { %v1936_v25 = vmul.f32 %v3465_v42, %v1934_v36  ;;  %v2213_v36 = vld [vmem:[%s4332_s2 + $0x80] sm:$0xff] }
0x2279   :  { %v1939_v35 = vpop.permute.xlu1 %1938 }
0x227a   :  { %v1941_v15 = vmul.f32 %v3465_v42, %v1939_v35 }
0x227c   :  { %1943 = vrot.lane.b32.xlu0 %v1941_v15, %s3569_s20 }
0x22ee   :  { %v1944_v45 = vpop.permute.xlu0 %1943 }
0x22ef   :  { %v1946_v37 = vadd.f32 %v1944_v45, %v1936_v25  ;;  %v2214_v25 = vld [vmem:[%s4332_s2 + $0x88] sm:$0xff]  ;;  %v2217_v45 = vld [vmem:[%s4332_s2 + $0xa0] sm:$0xff] }
0x22f1   :  { %3466 = vtanh.f32 %v1946_v37  ;;  %v1961_v46 = vrot.slane %v1946_v37, 4  ;;  %v3315_v37 = vpack.c.bf16 %v2214_v25, %v2213_v36 }
0x22fb   :  { %v3467_v40 = vpop.eup %3466 }
0x22fc   :  { %1949 = vrot.lane.b32.xlu1 %v3467_v40, %s3568_s17  ;;  %v2218_v40 = vld [vmem:[%s4332_s2 + $0xa8] sm:$0xff] }
0x2300   :  { %1962 = vrot.lane.b32.xlu1 %v1961_v46, %s3570_s23  ;;  %v2215_v46 = vld [vmem:[%s4332_s2 + $0x90] sm:$0xff] }
0x236e   :  { %v1950_v48 = vpop.permute.xlu1 %1949 }
0x236f   :  { %v1952_v23 = vmul.f32 %v3465_v42, %v1950_v48  ;;  %v2216_v48 = vld [vmem:[%s4332_s2 + $0x98] sm:$0xff] }
0x2371   :  { %v1954_v44 = vrot.slane %v1952_v23, 4  ;;  %v4178_v23 = vpack.c.bf16 %v2218_v40, %v2217_v45 }
0x2372   :  { %v1963_v54 = vpop.permute.xlu1 %1962 }
0x2373   :  { %1955 = vrot.lane.b32.xlu0 %v1954_v44, %s3569_s20  ;;  %v2219_v44 = vld [vmem:[%s4332_s2 + $0xb0] sm:$0xff] }
0x2377   :  { %1965 = vrot.lane.b32.xlu0 %v1839_v0, %s3570_s23 }
0x23e5   :  { %v1956_v50 = vpop.permute.xlu0 %1955 }
0x23e6   :  { %v1959_v51 = vsel %vm65_vm15, %v1956_v50, %v1849_v19  ;;  %v1969_v53 = vsel %vm65_vm15, %v1956_v50, 0.0  ;;  %v2220_v50 = vld [vmem:[%s4332_s2 + $0xb8] sm:$0xff] }
0x23e7   :  { %1971 = vst.msk [vmem:[#allocation3 + $0x14] sm:$0xf] %vm27_vm6, %v1969_v53  ;;  %3138 = vmatmul.mubr.msk.f32.vlgmr.msra.gmra.mrb[18].mxu0 %vm191_vm2, %v1959_v51  ;;  %v4188_v53 = vpack.c.bf16 %v2220_v50, %v2219_v44 }
0x23e8   :  { %3159 = vmatprep.mubr.msk.f32.mxu0 %vm3565_vm1, %v3566_v10  ;;  %3316 = vmatpush3.bf16.msra.mxu0 %v3315_v37 }
0x23e9   :  { %v1966_v55 = vpop.permute.xlu0 %1965  ;;  %3317 = vmatprep.subr.bf16.mxu0 %v3564_v3 }
0x23ea   :  { %v1968_v56 = vsel %vm65_vm15, %v1963_v54, %v1966_v55  ;;  %v25_v55 = vld [vmem:[%s4333_s3 + $0x10] sm:$0x3] }
0x23eb   :  { %2054 = vrot.lane.b32.xlu0 %v1968_v56, %s3569_s20 }
0x245d   :  { %v2055_v20 = vpop.permute.xlu0 %2054 }
0x24ba   :  { %v2041_v28 = vpop.f32.mrb[18].mxu0 }
0x24bb   :  { %v2045_v49 = vadd.f32 %v2041_v28, %v1253_v7  ;;  %v3139_v58 = vpop.f32.mrb[19].mxu0 }
0x24bd   :  { %3468 = vtanh.f32 %v2045_v49  ;;  %v2819_v59 = vmul.f32 -1.442695, %v2045_v49  ;;  %v2380_v49 = vrot.slane %v25_v55, 1 }
0x24bf   :  { %3470 = vpow2.f32 %v2819_v59 }
0x24c7   :  { %v3469_v13 = vpop.eup %3468 }
0x24c8   :  { %2059 = vrot.lane.b32.xlu1 %v3469_v13, %s3568_s17 }
0x24c9   :  { %v3471_v60 = vpop.eup %3470 }
0x24ca   :  { %v2049_v6 = vadd.f32 1.0, %v3471_v60 }
0x24cc   :  { %3472 = vrcp.f32 %v2049_v6 }
0x24d6   :  { %v3473_v9 = vpop.eup %3472 }
0x24d7   :  { %v2057_v63 = vmul.f32 %v3473_v9, %v2055_v20 }
0x253a   :  { %v2060_v16 = vpop.permute.xlu1 %2059 }
0x253b   :  { %v2062_v12 = vmul.f32 %v3473_v9, %v2060_v16 }
0x253d   :  { %2064 = vrot.lane.b32.xlu1 %v2062_v12, %s3569_s20 }
0x2541   :  { %2074 = vrot.lane.b32.xlu1 %v1959_v51, %s3570_s23  ;;  %v3318_v51 = vpack.c.bf16 %v2216_v48, %v2215_v46 }
0x2543   :  { %3319 = vmatpush3.bf16.msra.mxu0 %v3318_v51 }
0x2544   :  { %3326 = vmatprep.subr.bf16.mxu0 %v3564_v3 }
0x25af   :  { %v2065_v47 = vpop.permute.xlu1 %2064 }
0x25b0   :  { %v2067_v62 = vadd.f32 %v2065_v47, %v2057_v63 }
0x25b2   :  { %3474 = vtanh.f32 %v2067_v62  ;;  %v4154_v34 = vsel %vm71_vm3, %v2067_v62, %v2055_v20 }
0x25b3   :  { %v2075_v27 = vpop.permute.xlu1 %2074  ;;  %v2173_v42 = vrot.slane %v4154_v34, 4 }
0x25bc   :  { %v3475_v57 = vpop.eup %3474 }
0x25bd   :  { %2070 = vrot.lane.b32.xlu0 %v3475_v57, %s3568_s17 }
0x262f   :  { %v2071_v18 = vpop.permute.xlu0 %2070 }
0x2630   :  { %v4141_v22 = vmul.f32 %v3473_v9, %v2071_v18  ;;  %v2822_v9 = vld [vmem:[%s4332_s2 + $0xc0] ss:$0 sm:$0xff] }
0x2632   :  { %v2077_v1 = vsel %vm71_vm3, %v4141_v22, %v2075_v27 }
0x2633   :  { %2087 = vrot.lane.b32.xlu0 %v2077_v1, %s3569_s20 }
0x26a5   :  { %v2088_v21 = vpop.permute.xlu0 %2087 }
0x26a6   :  { %3149 = vmatmul.mubr.msk.f32.vlgmr.msra.gmra.mrb[18].mxu1 %vm191_vm2, %v2088_v21 }
0x26a7   :  { %3170 = vmatprep.mubr.msk.f32.mxu1 %vm3565_vm1, %v3566_v10  ;;  %3322 = vmatpush3.bf16.msra.mxu1 %v4178_v23 }
0x26a8   :  { %3323 = vmatprep.subr.bf16.mxu1 %v3564_v3 }
0x26ab   :  { %3325 = vmatpush3.bf16.msra.mxu1 %v4188_v53 }
0x26ac   :  { %3332 = vmatprep.subr.bf16.mxu1 %v3564_v3 }
0x26ae   :  { %3171 = vmatmul.mubr.msk.f32.vlgmr.msra.gmra.mrb[20].mxu1 %vm191_vm2, %v25_v55 }
0x26af   :  { %3334 = vmatpush3.bf16.msra.mxu1 %v4178_v23  ;;  %3192 = vmatprep.mubr.msk.f32.mxu1 %vm3565_vm1, %v3566_v10 }
0x26b0   :  { %3335 = vmatprep.subr.bf16.mxu1 %v3564_v3 }
0x26b3   :  { %3337 = vmatpush3.bf16.msra.mxu1 %v4188_v53 }
0x2779   :  { %v2157_v4 = vpop.f32.mrb[18].mxu1 }
0x277a   :  { %v2162_v11 = vrot.slane %v2157_v4, 4  ;;  %v3150_v17 = vpop.f32.mrb[19].mxu1 }
0x277c   :  { %v2164_v19 = vadd.f32 %v2162_v11, %v1253_v7 }
0x277e   :  { %3476 = vtanh.f32 %v2164_v19  ;;  %v2821_v26 = vmul.f32 -1.442695, %v2164_v19 }
0x2780   :  { %3478 = vpow2.f32 %v2821_v26 }
0x2781   :  { %v2368_v60 = vpop.f32.mrb[20].mxu1 }
0x2782   :  { %v3172_v6 = vpop.f32.mrb[21].mxu1 }
0x2788   :  { %v3477_v24 = vpop.eup %3476 }
0x2789   :  { %2177 = vrot.lane.b32.xlu1 %v3477_v24, %s3568_s17 }
0x278a   :  { %v3479_v30 = vpop.eup %3478 }
0x278b   :  { %v2168_v31 = vadd.f32 1.0, %v3479_v30 }
0x278d   :  { %3480 = vrcp.f32 %v2168_v31 }
0x2797   :  { %v3481_v32 = vpop.eup %3480 }
0x2798   :  { %v2175_v35 = vmul.f32 %v3481_v32, %v2173_v42 }
0x27fb   :  { %v2178_v33 = vpop.permute.xlu1 %2177 }
0x27fc   :  { %v2180_v61 = vmul.f32 %v3481_v32, %v2178_v33 }
0x27fe   :  { %2182 = vrot.lane.b32.xlu0 %v2180_v61, %s3569_s20 }
0x2870   :  { %v2183_v15 = vpop.permute.xlu0 %2182 }
0x2871   :  { %v4157_v0 = vadd.f32 %v2183_v15, %v2175_v35 }
0x2873   :  { %3482 = vtanh.f32 %v4157_v0 }
0x287d   :  { %v3483_v54 = vpop.eup %3482 }
0x287e   :  { %2188 = vrot.lane.b32.xlu1 %v3483_v54, %s3568_s17 }
0x28f0   :  { %v2189_v56 = vpop.permute.xlu1 %2188 }
0x28f1   :  { %v2191_v7 = vmul.f32 %v3481_v32, %v2189_v56 }
0x28f3   :  { %v2193_v28 = vrot.slane %v2191_v7, 4 }
0x28f5   :  { %2194 = vrot.lane.b32.xlu0 %v2193_v28, %s3569_s20 }
0x28f9   :  { %2381 = vrot.lane.b32.xlu0 %v2380_v49, %s3569_s20 }
0x2967   :  { %v2195_v58 = vpop.permute.xlu0 %2194 }
0x2968   :  { %v2198_v13 = vsel %vm77_vm8, %v2195_v58, %v2088_v21  ;;  %v2208_v59 = vsel %vm77_vm8, %v2195_v58, 0.0 }
0x2969   :  { %2210 = vst.msk [vmem:[#allocation3 + $0x1c] sm:$0xf] %vm27_vm6, %v2208_v59  ;;  %2211 = vst.msk [vmem:[%s4336_s6 + $0x4] sm:$0xf] %vm27_vm6, %v2198_v13  ;;  %3160 = vmatmul.mubr.msk.f32.vlgmr.msra.gmra.mrb[20].mxu0 %vm191_vm2, %v2198_v13 }
0x296a   :  { %3328 = vmatpush3.bf16.msra.mxu0 %v4178_v23  ;;  %3181 = vmatprep.mubr.msk.f32.mxu0 %vm3565_vm1, %v3566_v10 }
0x296b   :  { %3329 = vmatprep.subr.bf16.mxu0 %v3564_v3  ;;  %v2382_v4 = vpop.permute.xlu0 %2381 }
0x296e   :  { %3331 = vmatpush3.bf16.msra.mxu0 %v4188_v53 }
0x296f   :  { %3338 = vmatprep.subr.bf16.mxu0 %v3564_v3 }
0x2a3c   :  { %v2295_v16 = vpop.f32.mrb[20].mxu0 }
0x2a3d   :  { %v4225_v12 = vadd.f32 %v2822_v9, %v2295_v16  ;;  %v3161_v20 = vpop.f32.mrb[21].mxu0 }
0x2a3f   :  { %v2372_v63 = vadd.f32 %v2368_v60, %v4225_v12 }
0x2a41   :  { %3484 = vtanh.f32 %v2372_v63  ;;  %v2825_v62 = vmul.f32 -1.442695, %v2372_v63 }
0x2a43   :  { %3486 = vpow2.f32 %v2825_v62 }
0x2a4b   :  { %v3485_v47 = vpop.eup %3484 }
0x2a4c   :  { %2386 = vrot.lane.b32.xlu1 %v3485_v47, %s3568_s17 }
0x2a4d   :  { %v3487_v57 = vpop.eup %3486 }
0x2a4e   :  { %v2376_v18 = vadd.f32 1.0, %v3487_v57 }
0x2a50   :  { %3488 = vrcp.f32 %v2376_v18 }
0x2a5a   :  { %v3489_v27 = vpop.eup %3488 }
0x2a5b   :  { %v2384_v11 = vmul.f32 %v3489_v27, %v2382_v4 }
0x2abe   :  { %v2387_v1 = vpop.permute.xlu1 %2386 }
0x2abf   :  { %v2389_v21 = vmul.f32 %v3489_v27, %v2387_v1 }
0x2ac1   :  { %2391 = vrot.lane.b32.xlu1 %v2389_v21, %s3569_s20 }
0x2b33   :  { %v2392_v17 = vpop.permute.xlu1 %2391 }
0x2b34   :  { %v2394_v19 = vadd.f32 %v2392_v17, %v2384_v11 }
0x2b36   :  { %3490 = vtanh.f32 %v2394_v19 }
0x2b40   :  { %v3491_v24 = vpop.eup %3490 }
0x2b41   :  { %2397 = vrot.lane.b32.xlu0 %v3491_v24, %s3568_s17 }
0x2bb3   :  { %v2398_v26 = vpop.permute.xlu0 %2397 }
0x2bb4   :  { %v2400_v30 = vmul.f32 %v3489_v27, %v2398_v26 }
0x2bb6   :  { %2402 = vrot.lane.b32.xlu1 %v2400_v30, %s3569_s20 }
0x2c28   :  { %v2403_v31 = vpop.permute.xlu1 %2402 }
0x2c29   :  { %2406 = vst.msk [vmem:[#allocation5] sm:$0x1] %vm2405_vm7, %v2403_v31  ;;  %3182 = vmatmul.mubr.msk.f32.vlgmr.msra.gmra.mrb[22].mxu0 %vm191_vm2, %v2403_v31 }
0x2c2a   :  { %3340 = vmatpush3.bf16.msra.mxu0 %v4178_v23  ;;  %3203 = vmatprep.mubr.msk.f32.mxu0 %vm3565_vm1, %v3566_v10  ;;  %vm2514_vm1 = vcmask 254977  }
0x2c2b   :  { %3341 = vmatprep.subr.bf16.mxu0 %v3564_v3  ;;  %v2491_v3 = vrot.slane %v2394_v19, 7 }
0x2c2e   :  { %3343 = vmatpush3.bf16.msra.mxu0 %v4188_v53 }
0x2cfc   :  { %v2475_v32 = vpop.f32.mrb[22].mxu0 }
0x2cfd   :  { %v2480_v33 = vrot.slane %v2475_v32, 7  ;;  %v3183_v61 = vpop.f32.mrb[23].mxu0 }
0x2cfe   :  { %v1840_v61 = vsel %vm59_vm13, %v4103_v5, 0.0 }
0x2cff   :  { %v2482_v42 = vadd.f32 %v2480_v33, %v4225_v12  ;;  %v1130_v33 = vrot.slane %v3968_v52, 4 }
0x2d01   :  { %3492 = vtanh.f32 %v2482_v42  ;;  %v2827_v15 = vmul.f32 -1.442695, %v2482_v42  ;;  %v2200_v42 = vrot.slane %v4157_v0, 4 }
0x2d03   :  { %3494 = vpow2.f32 %v2827_v15 }
0x2d0b   :  { %v3493_v35 = vpop.eup %3492 }
0x2d0c   :  { %2495 = vrot.lane.b32.xlu0 %v3493_v35, %s3568_s17 }
0x2d0d   :  { %v3495_v36 = vpop.eup %3494 }
0x2d0e   :  { %v2486_v25 = vadd.f32 1.0, %v3495_v36 }
0x2d10   :  { %3496 = vrcp.f32 %v2486_v25 }
0x2d1a   :  { %v3497_v45 = vpop.eup %3496 }
0x2d1b   :  { %v2493_v40 = vmul.f32 %v3497_v45, %v2491_v3 }
0x2d7e   :  { %v2496_v10 = vpop.permute.xlu0 %2495 }
0x2d7f   :  { %v2498_v37 = vmul.f32 %v3497_v45, %v2496_v10  ;;  %v2079_v10 = vsel %vm71_vm3, %v4141_v22, 0.0 }
0x2d81   :  { %2500 = vrot.lane.b32.xlu1 %v2498_v37, %s3569_s20 }
0x2df3   :  { %v2501_v46 = vpop.permute.xlu1 %2500 }
0x2df4   :  { %v2503_v48 = vadd.f32 %v2501_v46, %v2493_v40 }
0x2df6   :  { %3498 = vtanh.f32 %v2503_v48  ;;  %v2603_v9 = vrot.slane %v2503_v48, 7 }
0x2e00   :  { %v3499_v23 = vpop.eup %3498 }
0x2e01   :  { %2506 = vrot.lane.b32.xlu0 %v3499_v23, %s3568_s17 }
0x2e73   :  { %v2507_v44 = vpop.permute.xlu0 %2506 }
0x2e74   :  { %v2509_v50 = vmul.f32 %v3497_v45, %v2507_v44  ;;  %v1601_v45 = vsel %vm47_vm9, %v4061_v8, 0.0 }
0x2e76   :  { %v2516_v51 = vrot.slane %v2509_v50, 1 }
0x2e78   :  { %2517 = vrot.lane.b32.xlu1 %v2516_v51, %s3569_s20 }
0x2eea   :  { %v2518_v53 = vpop.permute.xlu1 %2517 }
0x2eeb   :  { %3193 = vmatmul.mubr.msk.f32.vlgmr.msra.gmra.mrb[22].mxu1 %vm191_vm2, %v2518_v53 }
0x2fbe   :  { %v2587_v54 = vpop.f32.mrb[22].mxu1 }
0x2fbf   :  { %v2592_v55 = vrot.slane %v2587_v54, 6  ;;  %v3194_v56 = vpop.f32.mrb[23].mxu1 }
0x2fc1   :  { %v2594_v7 = vadd.f32 %v2592_v55, %v4225_v12 }
0x2fc3   :  { %3500 = vtanh.f32 %v2594_v7  ;;  %v2829_v49 = vmul.f32 -1.442695, %v2594_v7 }
0x2fc5   :  { %3502 = vpow2.f32 %v2829_v49 }
0x2fcd   :  { %v3501_v28 = vpop.eup %3500 }
0x2fce   :  { %2607 = vrot.lane.b32.xlu0 %v3501_v28, %s3568_s17 }
0x2fcf   :  { %v3503_v58 = vpop.eup %3502 }
0x2fd0   :  { %v2598_v13 = vadd.f32 1.0, %v3503_v58 }
0x2fd2   :  { %3504 = vrcp.f32 %v2598_v13 }
0x2fdc   :  { %v3505_v59 = vpop.eup %3504 }
0x2fdd   :  { %v2605_v16 = vmul.f32 %v3505_v59, %v2603_v9 }
0x3040   :  { %v2608_v60 = vpop.permute.xlu0 %2607 }
0x3041   :  { %v2610_v6 = vmul.f32 %v3505_v59, %v2608_v60 }
0x3043   :  { %2612 = vrot.lane.b32.xlu1 %v2610_v6, %s3569_s20 }
0x30b5   :  { %v2613_v20 = vpop.permute.xlu1 %2612 }
0x30b6   :  { %v2615_v63 = vadd.f32 %v2613_v20, %v2605_v16 }
0x30b8   :  { %3506 = vtanh.f32 %v2615_v63  ;;  %v2715_v52 = vrot.slane %v2615_v63, 7 }
0x30c2   :  { %v3507_v47 = vpop.eup %3506 }
0x30c3   :  { %2618 = vrot.lane.b32.xlu0 %v3507_v47, %s3568_s17 }
0x3135   :  { %v2619_v62 = vpop.permute.xlu0 %2618 }
0x3136   :  { %v2621_v57 = vmul.f32 %v3505_v59, %v2619_v62 }
0x3138   :  { %v2628_v18 = vrot.slane %v2621_v57, 2 }
0x313a   :  { %2629 = vrot.lane.b32.xlu1 %v2628_v18, %s3569_s20 }
0x31ac   :  { %v2630_v27 = vpop.permute.xlu1 %2629 }
0x31ad   :  { %3204 = vmatmul.mubr.msk.f32.vlgmr.msra.gmra.mrb[24].mxu0 %vm191_vm2, %v2630_v27 }
0x3280   :  { %v2699_v1 = vpop.f32.mrb[24].mxu0 }
0x3281   :  { %v2704_v21 = vrot.slane %v2699_v1, 5  ;;  %v3205_v4 = vpop.f32.mrb[25].mxu0 }
0x3283   :  { %v2706_v11 = vadd.f32 %v2704_v21, %v4225_v12  ;;  %v1363_v12 = vsel %vm35_vm4, %v3995_v41, 0.0 }
0x3285   :  { %3508 = vtanh.f32 %v2706_v11  ;;  %v2831_v19 = vmul.f32 -1.442695, %v2706_v11 }
0x3287   :  { %3510 = vpow2.f32 %v2831_v19 }
0x328f   :  { %v3509_v17 = vpop.eup %3508 }
0x3290   :  { %2719 = vrot.lane.b32.xlu0 %v3509_v17, %s3568_s17 }
0x3291   :  { %v3511_v24 = vpop.eup %3510 }
0x3292   :  { %v2710_v26 = vadd.f32 1.0, %v3511_v24 }
0x3294   :  { %3512 = vrcp.f32 %v2710_v26 }
0x329e   :  { %v3513_v30 = vpop.eup %3512 }
0x329f   :  { %v2717_v35 = vmul.f32 %v3513_v30, %v2715_v52 }
0x3302   :  { %v2720_v31 = vpop.permute.xlu0 %2719 }
0x3303   :  { %v2722_v32 = vmul.f32 %v3513_v30, %v2720_v31 }
0x3305   :  { %2724 = vrot.lane.b32.xlu1 %v2722_v32, %s3569_s20 }
0x3309   :  { %1131 = vrot.lane.b32.xlu1 %v1130_v33, %s3570_s23 }
0x330d   :  { %1365 = vrot.lane.b32.xlu1 %v1363_v12, %s3569_s20 }
0x3311   :  { %1842 = vrot.lane.b32.xlu1 %v1840_v61, %s3569_s20 }
0x3315   :  { %2201 = vrot.lane.b32.xlu1 %v2200_v42, %s3570_s23 }
0x3319   :  { %2511 = vrot.lane.b32.xlu1 %v2509_v50, %s3569_s20 }
0x3377   :  { %v2725_v15 = vpop.permute.xlu1 %2724 }
0x3378   :  { %v2727_v36 = vadd.f32 %v2725_v15, %v2717_v35 }
0x337a   :  { %3514 = vtanh.f32 %v2727_v36 }
0x337b   :  { %v1132_v39 = vpop.permute.xlu1 %1131 }
0x337f   :  { %v1366_v41 = vpop.permute.xlu1 %1365 }
0x3380   :  { %1368 = vst.msk [vmem:[#allocation3] sm:$0xf] %vm27_vm6, %v1366_v41 }
0x3383   :  { %v1843_v25 = vpop.permute.xlu1 %1842 }
0x3384   :  { %v3515_v43 = vpop.eup %3514  ;;  %1846 = vst.msk [vmem:[#allocation3 + $0x10] sm:$0xf] %vm27_vm6, %v1843_v25 }
0x3385   :  { %2730 = vrot.lane.b32.xlu0 %v3515_v43, %s3568_s17 }
0x3387   :  { %v2202_v5 = vpop.permute.xlu1 %2201 }
0x3389   :  { %1134 = vrot.lane.b32.xlu0 %v3965_v14, %s3570_s23 }
0x338b   :  { %v2512_v0 = vpop.permute.xlu1 %2511 }
0x338c   :  { %2515 = vst.msk [vmem:[#allocation5] sm:$0x2] %vm2514_vm1, %v2512_v0 }
0x338d   :  { %1603 = vrot.lane.b32.xlu0 %v1601_v45, %s3569_s20 }
0x3391   :  { %2081 = vrot.lane.b32.xlu0 %v2079_v10, %s3569_s20 }
0x3395   :  { %2204 = vrot.lane.b32.xlu0 %v4154_v34, %s3570_s23 }
0x3399   :  { %2623 = vrot.lane.b32.xlu0 %v2621_v57, %s3569_s20 }
0x339d   :  { %2742 = vrot.lane.b32.xlu0 %v2727_v36, %s3570_s23  ;;  %s3516_s23 = scalar_lea.vmem %s2752_s24, 640 }
0x339e   :  { %p3517_p0 = scmp.ne.s32.totalorder %s2752_s24, %s3516_s23  ;;  %p3522_p2 = scmp.lt.s32.totalorder %s3516_s23, %s3516_s23 }
0x33a0   :  { %p3523_p3 = por %p3522_p2, %p3521_p1 }
0x33a2   :  { %p3524_p4 = pnand %p3523_p3, %p3517_p0 }
0x33f7   :  { %v2731_v14 = vpop.permute.xlu0 %2730 }
0x33f8   :  { %v2733_v37 = vmul.f32 %v3513_v30, %v2731_v14 }
0x33fa   :  { %2735 = vrot.lane.b32.xlu1 %v2733_v37, %s3569_s20 }
0x33fb   :  { %v1135_v38 = vpop.permute.xlu0 %1134 }
0x33fc   :  { %v1137_v8 = vsel %vm77_vm8, %v1132_v39, %v1135_v38 }
0x33fd   :  { %1141 = vst.msk [vmem:[%s4336_s6 + $0x8] sm:$0xf] %vm27_vm6, %v1137_v8 }
0x33ff   :  { %v1604_v29 = vpop.permute.xlu0 %1603 }
0x3400   :  { %1607 = vst.msk [vmem:[#allocation3 + $0x8] sm:$0xf] %vm27_vm6, %v1604_v29 }
0x3403   :  { %v2082_v22 = vpop.permute.xlu0 %2081 }
0x3404   :  { %2085 = vst.msk [vmem:[#allocation3 + $0x18] sm:$0xf] %vm27_vm6, %v2082_v22 }
0x3405   :  { %3527 = shalt.err (!%p3524_p4)
}
0x3406   :  { %s3528_s26 = scalar_lea.hbm %s4334_s4, 640 }
0x3407   :  { %p3529_p5 = scmp.ne.s32.totalorder %s4334_s4, %s3528_s26  ;;  %p3532_p6 = scmp.lt.u32.totalorder %s3528_s26, %s4334_s4 }
0x3409   :  { %p3534_p7 = pnand %p3532_p6, %p3529_p5 }
0x340b   :  { %3537 = shalt.err (!%p3534_p7)
}
0x340c   :  { %s3572_s30 = smov 4   ;;  %v2205_v34 = vpop.permute.xlu0 %2204  ;;  %vm2626_vm2 = vcmask 256002   ;;  %vm2738_vm4 = vcmask 257027   ;;  %s3573_s13 = smov [#allocation5]  }
0x340d   :  { %2757 = dma.vmem_to_hbm [thread:$0]  %s2752_s24, 640, %s4334_s4, [#allocation4], %s3568_s17, %s3568_s17, %s3572_s30   ;;  %v2207_v3 = vsel %vm77_vm8, %v2202_v5, %v2205_v34 }
0x340e   :  { %2212 = vst.msk [vmem:[%s4336_s6 + $0xc] sm:$0xf] %vm27_vm6, %v2207_v3  ;;  %s2764_s4 = sshll.u32 %s3573_s13, 4  ;;  %s2765_s4 = int_to_ptr.vmem [resolvable:$true] %s2764_s4 }
0x340f   :  { %s3538_s15 = scalar_lea.vmem %s2765_s4, 64  ;;  %p3543_p9 = scmp.lt.s32.totalorder %s2765_s4, %s2765_s4 }
0x3410   :  { %v2624_v40 = vpop.permute.xlu0 %2623  ;;  %p3539_p8 = scmp.ne.s32.totalorder %s2765_s4, %s3538_s15  ;;  %p3544_p10 = scmp.lt.s32.totalorder %s3538_s15, %s3538_s15 }
0x3411   :  { %2627 = vst.msk [vmem:[#allocation5] sm:$0x4] %vm2626_vm2, %v2624_v40 }
0x3412   :  { %p3545_p11 = por %p3544_p10, %p3543_p9 }
0x3414   :  { %v2743_v46 = vpop.permute.xlu0 %2742  ;;  %p3546_p12 = pnand %p3545_p11, %p3539_p8 }
0x3415   :  { %2745 = vst.msk [vmem:[%s4336_s6 + $0xe] sm:$0x8] %vm2738_vm4, %v2743_v46 }
0x346c   :  { %v2736_v48 = vpop.permute.xlu1 %2735 }
0x346d   :  { %2739 = vst.msk [vmem:[#allocation5] sm:$0x8] %vm2738_vm4, %v2736_v48  ;;  %2740 = vst.msk [vmem:[%s4336_s6 + $0xd] sm:$0x8] %vm2738_vm4, %v2736_v48 }
0x346e   :  { %3549 = shalt.err (!%p3546_p12)
}
0x346f   :  { %s3550_s18 = scalar_lea.hbm %s4335_s5, 64 }
0x3470   :  { %p3551_p13 = scmp.ne.s32.totalorder %s4335_s5, %s3550_s18  ;;  %p3554_p0 = scmp.lt.u32.totalorder %s3550_s18, %s4335_s5 }
0x3472   :  { %p3556_p1 = pnand %p3554_p0, %p3551_p13 }
0x3474   :  { %3559 = shalt.err (!%p3556_p1)
}
0x3475   :  { %2767 = dma.vmem_to_hbm [thread:$0]  %s2765_s4, 64, %s4335_s5, [#allocation6]  }
0x3476   :  { %3560 = dma.done.wait [#allocation4], 640  }
0x3477   :  { %3561 = vsyncadd [#allocation4], 4294966656 }
0x3478   :  { %3562 = dma.done.wait [#allocation6], 64  }
0x3479   :  { %3563 = vsyncadd [#allocation6], 4294967232 }
0x347a   :  { %2778 = vsyncpa [#allocation4], 1 }
0x347b   :  { %2779 = vsyncpa [#allocation6], 1 }

</bundles_post_ra>
